<compile_context>
chip_gen: v5e
topology: v5e:2x2
jax: 0.10.0
libtpu: 0.0.40
codegen_flags: <defaults>
</compile_context>

<pallas_src>
import functools

import jax
import jax.numpy as jnp
from jax.experimental import pallas as pl
from jax.experimental.pallas import tpu as pltpu


LN_EPS = 1e-6  # matches nn.LayerNorm(embedding_size, eps=1e-06) in the reference module


def _layernorm(x, gamma, beta):
    # x: (N, E) f32; gamma/beta: (1, E) f32
    mean = jnp.mean(x, axis=-1, keepdims=True)
    xc = x - mean
    var = jnp.mean(xc * xc, axis=-1, keepdims=True)
    inv = jax.lax.rsqrt(var + LN_EPS)
    return xc * inv * gamma + beta


def encoder_stack_kernel(
    x_ref,
    ln1_g_ref, ln1_b_ref,
    wq_ref, bq_ref, wk_ref, bk_ref, wv_ref, bv_ref,
    wo_ref, bo_ref,
    ln2_g_ref, ln2_b_ref,
    w1_ref, b1_ref,
    w2_ref, b2_ref,
    fg_ref, fb_ref,
    inter_ref, ln_out_ref,
    x_carry,
    *, n_heads,
):
    l = pl.program_id(0)
    B, S, E = x_ref.shape
    H = n_heads
    Dh = E // H
    N = B * S

    # Load the encoder input into the VMEM carry buffer once (layer 0).
    @pl.when(l == 0)
    def _():
        x_carry[...] = x_ref[...].astype(jnp.float32)

    # Running activation for this layer, flattened for all dense ops.
    x = x_carry[...].reshape(N, E)                                  # (N, E) f32

    # ---- ln_1 (f32) ----
    xn = _layernorm(x, ln1_g_ref[0], ln1_b_ref[0])
    xn_b = xn.astype(jnp.bfloat16)

    # ---- QKV projections (bf16 MXU, f32 accumulate).  1/sqrt(Dh) folded into wq/bq. ----
    q = jnp.dot(xn_b, wq_ref[0], preferred_element_type=jnp.float32) + bq_ref[0]
    k = jnp.dot(xn_b, wk_ref[0], preferred_element_type=jnp.float32) + bk_ref[0]
    v = jnp.dot(xn_b, wv_ref[0], preferred_element_type=jnp.float32) + bv_ref[0]

    def _to_heads(t):
        # (N, E) -> (B*H, S, Dh): heads become a leading batch dim for batched matmuls.
        t = t.reshape(B, S, H, Dh)
        t = jnp.transpose(t, (0, 2, 1, 3))
        return t.reshape(B * H, S, Dh)

    qh = _to_heads(q).astype(jnp.bfloat16)
    kh = _to_heads(k).astype(jnp.bfloat16)
    vh = _to_heads(v).astype(jnp.bfloat16)

    # ---- attention (batched over B*H), softmax in f32 ----
    scores = jnp.einsum("gsd,gtd->gst", qh, kh,
                        preferred_element_type=jnp.float32)        # (B*H, S, S)
    scores = scores - jnp.max(scores, axis=-1, keepdims=True)
    p = jnp.exp(scores)
    p = p * pl.reciprocal(jnp.sum(p, axis=-1, keepdims=True), approx=True)
    ctx = jnp.einsum("gst,gtd->gsd", p.astype(jnp.bfloat16), vh,
                     preferred_element_type=jnp.float32)           # (B*H, S, Dh)

    # (B*H, S, Dh) -> (N, E)
    ctx = ctx.reshape(B, H, S, Dh)
    ctx = jnp.transpose(ctx, (0, 2, 1, 3)).reshape(N, E)

    # ---- output projection, dropout -> identity, residual ----
    attn = jnp.dot(ctx.astype(jnp.bfloat16), wo_ref[0],
                   preferred_element_type=jnp.float32) + bo_ref[0]
    x1 = attn + x                                                   # (N, E) f32

    # ---- ln_2 + MLP (Linear -> ReLU -> Linear); torchvision.ops.MLP default act = ReLU ----
    y = _layernorm(x1, ln2_g_ref[0], ln2_b_ref[0])
    h1 = jnp.dot(y.astype(jnp.bfloat16), w1_ref[0],
                 preferred_element_type=jnp.float32) + b1_ref[0]
    h1 = jnp.maximum(h1, 0.0)
    y2 = jnp.dot(h1.astype(jnp.bfloat16), w2_ref[0],
                 preferred_element_type=jnp.float32) + b2_ref[0]

    out = x1 + y2                                                   # (N, E) f32

    # Carry the activation forward in VMEM and emit this layer's intermediate output.
    x_carry[...] = out.reshape(B, S, E)
    inter_ref[...] = out.reshape(1, B, S, E).astype(inter_ref.dtype)

    # Fused final encoder LayerNorm on the last layer.
    @pl.when(l == pl.num_programs(0) - 1)
    def _():
        fo = _layernorm(out, fg_ref[...], fb_ref[...])
        ln_out_ref[...] = fo.reshape(B, S, E).astype(ln_out_ref.dtype)


def layernorm_kernel(x_ref, g_ref, b_ref, out_ref):
    # Fallback standalone LayerNorm (used only if there are zero encoder layers).
    B, S, E = x_ref.shape
    x = x_ref[...].astype(jnp.float32).reshape(B * S, E)
    out_ref[...] = _layernorm(x, g_ref[...], b_ref[...]).reshape(B, S, E).astype(out_ref.dtype)


def _resident_spec(shape):
    # Whole-array block, same block every grid step (stays resident in VMEM).
    nd = len(shape)
    return pl.BlockSpec(shape, lambda l, _nd=nd: (0,) * _nd)


def _per_layer_spec(shape):
    # Stacked (L, ...) tensor: pick block `l` along the leading layer axis.
    nd = len(shape)
    return pl.BlockSpec((1,) + shape[1:], lambda l, _nd=nd: (l,) + (0,) * (_nd - 1))


def run_encoder_stack(x, p, final_ln, n_heads):
    B, S, E = x.shape
    L = p["wq"].shape[0]

    kernel = functools.partial(encoder_stack_kernel, n_heads=n_heads)

    weight_keys = [
        "ln1_g", "ln1_b",
        "wq", "bq", "wk", "bk", "wv", "bv",
        "wo", "bo",
        "ln2_g", "ln2_b",
        "w1", "b1", "w2", "b2",
    ]

    in_specs = [pl.BlockSpec((B, S, E), lambda l: (0, 0, 0))]
    in_specs += [_per_layer_spec(p[k].shape) for k in weight_keys]
    in_specs += [_resident_spec(final_ln["g"].shape), _resident_spec(final_ln["b"].shape)]

    args = [x] + [p[k] for k in weight_keys] + [final_ln["g"], final_ln["b"]]

    out_shape = (
        jax.ShapeDtypeStruct((L, B, S, E), x.dtype),   # per-layer intermediates
        jax.ShapeDtypeStruct((B, S, E), x.dtype),      # final LayerNorm output
    )
    out_specs = (
        pl.BlockSpec((1, B, S, E), lambda l: (l, 0, 0, 0)),
        pl.BlockSpec((B, S, E), lambda l: (0, 0, 0)),
    )

    inter, ln_out = pl.pallas_call(
        kernel,
        out_shape=out_shape,
        grid=(L,),
        in_specs=in_specs,
        out_specs=out_specs,
        scratch_shapes=[pltpu.VMEM((B, S, E), jnp.float32)],
        compiler_params=pltpu.CompilerParams(dimension_semantics=("arbitrary",)),
    )(*args)
    return inter, ln_out


def run_layernorm(x, gamma, beta):
    B, S, E = x.shape
    return pl.pallas_call(
        layernorm_kernel,
        out_shape=jax.ShapeDtypeStruct((B, S, E), x.dtype),
        grid=(1,),
        in_specs=[
            pl.BlockSpec((B, S, E), lambda b: (b, 0, 0)),
            _resident_spec((1, E)), _resident_spec((1, E)),
        ],
        out_specs=pl.BlockSpec((B, S, E), lambda b: (b, 0, 0)),
        compiler_params=pltpu.CompilerParams(dimension_semantics=("arbitrary",)),
    )(x, gamma, beta)


def encoder_forward(x, stacked_params, final_ln, n_heads):
    """Matches Encoder.forward: returns (final_layernorm(x), [intermediate outputs])."""
    # input dropout -> identity (eval)
    if stacked_params is None:
        return run_layernorm(x, final_ln["g"], final_ln["b"]), []
    inter, ln_out = run_encoder_stack(x, stacked_params, final_ln, n_heads)
    L = inter.shape[0]
    intermediates = [inter[i] for i in range(L)]
    return ln_out, intermediates


def init_params(key, n_layers, E, M, n_heads):
    """Per-layer weights stacked along a leading layer axis (right-multiply layout)."""
    if n_layers == 0:
        final_ln = {"g": jnp.ones((1, E), jnp.float32), "b": jnp.zeros((1, E), jnp.float32)}
        return None, final_ln

    Dh = E // n_heads
    q_scale = 1.0 / (Dh ** 0.5)
    s = 0.02
    L = n_layers
    ks = jax.random.split(key, 8)

    wq = s * jax.random.normal(ks[0], (L, E, E), jnp.float32)
    wk = s * jax.random.normal(ks[1], (L, E, E), jnp.float32)
    wv = s * jax.random.normal(ks[2], (L, E, E), jnp.float32)
    wo = s * jax.random.normal(ks[3], (L, E, E), jnp.float32)
    w1 = s * jax.random.normal(ks[4], (L, E, M), jnp.float32)
    w2 = s * jax.random.normal(ks[5], (L, M, E), jnp.float32)
    b1 = s * jax.random.normal(ks[6], (L, 1, M), jnp.float32)
    b2 = s * jax.random.normal(ks[7], (L, 1, E), jnp.float32)

    stacked = {
        "ln1_g": jnp.ones((L, 1, E), jnp.float32),
        "ln1_b": jnp.zeros((L, 1, E), jnp.float32),
        # 1/sqrt(Dh) attention scale folded into the Q projection (weights + bias).
        "wq": (wq * q_scale).astype(jnp.bfloat16),
        "bq": jnp.zeros((L, 1, E), jnp.float32) * q_scale,
        "wk": wk.astype(jnp.bfloat16),
        "bk": jnp.zeros((L, 1, E), jnp.float32),
        "wv": wv.astype(jnp.bfloat16),
        "bv": jnp.zeros((L, 1, E), jnp.float32),
        "wo": wo.astype(jnp.bfloat16),
        "bo": jnp.zeros((L, 1, E), jnp.float32),
        "ln2_g": jnp.ones((L, 1, E), jnp.float32),
        "ln2_b": jnp.zeros((L, 1, E), jnp.float32),
        "w1": w1.astype(jnp.bfloat16),
        "b1": b1,
        "w2": w2.astype(jnp.bfloat16),
        "b2": b2,
    }
    final_ln = {"g": jnp.ones((1, E), jnp.float32), "b": jnp.zeros((1, E), jnp.float32)}
    return stacked, final_ln


if __name__ == "__main__":
    # Small config consistent with Encoder(n_encoder_layers, embedding_size, n_heads, dim_mlp, dropout)
    B, S = 2, 8
    n_layers, E, n_heads, M, dropout = 2, 32, 4, 64, 0.1
    assert E % n_heads == 0

    key = jax.random.PRNGKey(0)
    kx, kp = jax.random.split(key)
    x = jax.random.normal(kx, (B, S, E), dtype=jnp.float32)

    stacked_params, final_ln = init_params(kp, n_layers, E, M, n_heads)

    out, intermediates = encoder_forward(x, stacked_params, final_ln, n_heads)
    out = jax.block_until_ready(out)
    for t in intermediates:
        jax.block_until_ready(t)

    assert out.shape == (B, S, E)
    assert len(intermediates) == n_layers
    assert all(t.shape == (B, S, E) for t in intermediates)
    assert bool(jnp.all(jnp.isfinite(out)))
    print("KERNEL_OK")
</pallas_src>

<mosaic_0001>
module attributes {stable_mosaic.version = 11 : i64} {
  func.func @encoder_stack_kernel(%arg0: i32, %arg1: memref<2x8x32xf32, #tpu.memory_space<vmem>>, %arg2: memref<1x1x32xf32, #tpu.memory_space<vmem>>, %arg3: memref<1x1x32xf32, #tpu.memory_space<vmem>>, %arg4: memref<1x32x32xbf16, #tpu.memory_space<vmem>>, %arg5: memref<1x1x32xf32, #tpu.memory_space<vmem>>, %arg6: memref<1x32x32xbf16, #tpu.memory_space<vmem>>, %arg7: memref<1x1x32xf32, #tpu.memory_space<vmem>>, %arg8: memref<1x32x32xbf16, #tpu.memory_space<vmem>>, %arg9: memref<1x1x32xf32, #tpu.memory_space<vmem>>, %arg10: memref<1x32x32xbf16, #tpu.memory_space<vmem>>, %arg11: memref<1x1x32xf32, #tpu.memory_space<vmem>>, %arg12: memref<1x1x32xf32, #tpu.memory_space<vmem>>, %arg13: memref<1x1x32xf32, #tpu.memory_space<vmem>>, %arg14: memref<1x32x64xbf16, #tpu.memory_space<vmem>>, %arg15: memref<1x1x64xf32, #tpu.memory_space<vmem>>, %arg16: memref<1x64x32xbf16, #tpu.memory_space<vmem>>, %arg17: memref<1x1x32xf32, #tpu.memory_space<vmem>>, %arg18: memref<1x32xf32, #tpu.memory_space<vmem>>, %arg19: memref<1x32xf32, #tpu.memory_space<vmem>>, %arg20: memref<1x2x8x32xf32, #tpu.memory_space<vmem>>, %arg21: memref<2x8x32xf32, #tpu.memory_space<vmem>>, %arg22: memref<2x8x32xf32, #tpu.memory_space<vmem>>) attributes {dimension_semantics = [#tpu.dimension_semantics<arbitrary>], iteration_bounds = array<i64: 2>, scalar_prefetch = 0 : i64, scratch_operands = 1 : i64, tpu.core_type = #tpu.core_type<tc>, window_params = [{pipeline_mode = #tpu.pipeline_mode<synchronous>, transform_indices = @transform_0, window_bounds = array<i64: 2, 8, 32>}, {transform_indices = @transform_1, window_bounds = array<i64: 1, 1, 32>}, {transform_indices = @transform_2, window_bounds = array<i64: 1, 1, 32>}, {transform_indices = @transform_3, window_bounds = array<i64: 1, 32, 32>}, {transform_indices = @transform_4, window_bounds = array<i64: 1, 1, 32>}, {transform_indices = @transform_5, window_bounds = array<i64: 1, 32, 32>}, {transform_indices = @transform_6, window_bounds = array<i64: 1, 1, 32>}, {transform_indices = @transform_7, window_bounds = array<i64: 1, 32, 32>}, {transform_indices = @transform_8, window_bounds = array<i64: 1, 1, 32>}, {transform_indices = @transform_9, window_bounds = array<i64: 1, 32, 32>}, {transform_indices = @transform_10, window_bounds = array<i64: 1, 1, 32>}, {transform_indices = @transform_11, window_bounds = array<i64: 1, 1, 32>}, {transform_indices = @transform_12, window_bounds = array<i64: 1, 1, 32>}, {transform_indices = @transform_13, window_bounds = array<i64: 1, 32, 64>}, {transform_indices = @transform_14, window_bounds = array<i64: 1, 1, 64>}, {transform_indices = @transform_15, window_bounds = array<i64: 1, 64, 32>}, {transform_indices = @transform_16, window_bounds = array<i64: 1, 1, 32>}, {pipeline_mode = #tpu.pipeline_mode<synchronous>, transform_indices = @transform_17, window_bounds = array<i64: 1, 32>}, {pipeline_mode = #tpu.pipeline_mode<synchronous>, transform_indices = @transform_18, window_bounds = array<i64: 1, 32>}, {transform_indices = @transform_19, window_bounds = array<i64: 1, 2, 8, 32>}, {pipeline_mode = #tpu.pipeline_mode<synchronous>, transform_indices = @transform_20, window_bounds = array<i64: 2, 8, 32>}]} {
    %c0_i32 = arith.constant 0 : i32
    %0 = arith.cmpi eq, %arg0, %c0_i32 : i32
    %1 = arith.extui %0 : i1 to i32
    %c0_i32_0 = arith.constant 0 : i32
    %2 = arith.cmpi ne, %1, %c0_i32_0 : i32
    scf.if %2 {
      %c0_79 = arith.constant 0 : index
      %c0_80 = arith.constant 0 : index
      %c0_81 = arith.constant 0 : index
      %138 = vector.load %arg1[%c0_79, %c0_80, %c0_81] : memref<2x8x32xf32, #tpu.memory_space<vmem>>, vector<2x8x32xf32>
      %c0_82 = arith.constant 0 : index
      %c0_83 = arith.constant 0 : index
      %c0_84 = arith.constant 0 : index
      %139 = vector.load %arg22[%c0_82, %c0_83, %c0_84] : memref<2x8x32xf32, #tpu.memory_space<vmem>>, vector<2x8x32xf32>
      tpu.vector_store %arg22[%c0_82, %c0_83, %c0_84], %138 {strides = array<i32>} : memref<2x8x32xf32, #tpu.memory_space<vmem>>, vector<2x8x32xf32>,
    } else {
    }
    %c0 = arith.constant 0 : index
    %c0_1 = arith.constant 0 : index
    %c0_2 = arith.constant 0 : index
    %3 = vector.load %arg22[%c0, %c0_1, %c0_2] : memref<2x8x32xf32, #tpu.memory_space<vmem>>, vector<2x8x32xf32>
    %4 = vector.shape_cast %3 : vector<2x8x32xf32> to vector<16x32xf32>
    %c0_3 = arith.constant 0 : index
    %c0_4 = arith.constant 0 : index
    %c0_5 = arith.constant 0 : index
    %5 = vector.load %arg2[%c0_3, %c0_4, %c0_5] : memref<1x1x32xf32, #tpu.memory_space<vmem>>, vector<1x1x32xf32>
    %6 = vector.shape_cast %5 : vector<1x1x32xf32> to vector<1x32xf32>
    %c0_6 = arith.constant 0 : index
    %c0_7 = arith.constant 0 : index
    %c0_8 = arith.constant 0 : index
    %7 = vector.load %arg3[%c0_6, %c0_7, %c0_8] : memref<1x1x32xf32, #tpu.memory_space<vmem>>, vector<1x1x32xf32>
    %8 = vector.shape_cast %7 : vector<1x1x32xf32> to vector<1x32xf32>
    %cst = arith.constant dense<0.000000e+00> : vector<16xf32>
    %9 = vector.multi_reduction <add>, %4, %cst [1] : vector<16x32xf32> to vector<16xf32>
    %10 = vector.shape_cast %9 : vector<16xf32> to vector<16x1xf32>
    %cst_9 = arith.constant 3.200000e+01 : f32
    %11 = vector.broadcast %cst_9 : f32 to vector<16x1xf32>
    %12 = arith.divf %10, %11 : vector<16x1xf32>
    %13 = vector.broadcast %12 : vector<16x1xf32> to vector<16x32xf32>
    %14 = arith.subf %4, %13 : vector<16x32xf32>
    %15 = arith.mulf %14, %14 : vector<16x32xf32>
    %cst_10 = arith.constant dense<0.000000e+00> : vector<16xf32>
    %16 = vector.multi_reduction <add>, %15, %cst_10 [1] : vector<16x32xf32> to vector<16xf32>
    %17 = vector.shape_cast %16 : vector<16xf32> to vector<16x1xf32>
    %cst_11 = arith.constant 3.200000e+01 : f32
    %18 = vector.broadcast %cst_11 : f32 to vector<16x1xf32>
    %19 = arith.divf %17, %18 : vector<16x1xf32>
    %cst_12 = arith.constant 9.99999997E-7 : f32
    %20 = vector.broadcast %cst_12 : f32 to vector<16x1xf32>
    %21 = arith.addf %19, %20 : vector<16x1xf32>
    %22 = math.rsqrt %21 : vector<16x1xf32>
    %23 = vector.broadcast %22 : vector<16x1xf32> to vector<16x32xf32>
    %24 = arith.mulf %14, %23 : vector<16x32xf32>
    %25 = vector.broadcast %6 : vector<1x32xf32> to vector<16x32xf32>
    %26 = arith.mulf %24, %25 : vector<16x32xf32>
    %27 = vector.broadcast %8 : vector<1x32xf32> to vector<16x32xf32>
    %28 = arith.addf %26, %27 : vector<16x32xf32>
    %29 = arith.truncf %28 : vector<16x32xf32> to vector<16x32xbf16>
    %c0_13 = arith.constant 0 : index
    %c0_14 = arith.constant 0 : index
    %c0_15 = arith.constant 0 : index
    %30 = vector.load %arg4[%c0_13, %c0_14, %c0_15] : memref<1x32x32xbf16, #tpu.memory_space<vmem>>, vector<1x32x32xbf16>
    %31 = vector.shape_cast %30 : vector<1x32x32xbf16> to vector<32x32xbf16>
    %cst_16 = arith.constant dense<0.000000e+00> : vector<16x32xf32>
    %32 = tpu.matmul %29, %31, %cst_16 {dimension_numbers = #tpu.dot_dimension_numbers<[1], [0], [0], [1], [0, 0, 1, 1], [], []>} : vector<16x32xbf16>, vector<32x32xbf16>, vector<16x32xf32> -> vector<16x32xf32>
    %c0_17 = arith.constant 0 : index
    %c0_18 = arith.constant 0 : index
    %c0_19 = arith.constant 0 : index
    %33 = vector.load %arg5[%c0_17, %c0_18, %c0_19] : memref<1x1x32xf32, #tpu.memory_space<vmem>>, vector<1x1x32xf32>
    %34 = vector.shape_cast %33 : vector<1x1x32xf32> to vector<1x32xf32>
    %35 = vector.broadcast %34 : vector<1x32xf32> to vector<16x32xf32>
    %36 = arith.addf %32, %35 : vector<16x32xf32>
    %c0_20 = arith.constant 0 : index
    %c0_21 = arith.constant 0 : index
    %c0_22 = arith.constant 0 : index
    %37 = vector.load %arg6[%c0_20, %c0_21, %c0_22] : memref<1x32x32xbf16, #tpu.memory_space<vmem>>, vector<1x32x32xbf16>
    %38 = vector.shape_cast %37 : vector<1x32x32xbf16> to vector<32x32xbf16>
    %cst_23 = arith.constant dense<0.000000e+00> : vector<16x32xf32>
    %39 = tpu.matmul %29, %38, %cst_23 {dimension_numbers = #tpu.dot_dimension_numbers<[1], [0], [0], [1], [0, 0, 1, 1], [], []>} : vector<16x32xbf16>, vector<32x32xbf16>, vector<16x32xf32> -> vector<16x32xf32>
    %c0_24 = arith.constant 0 : index
    %c0_25 = arith.constant 0 : index
    %c0_26 = arith.constant 0 : index
    %40 = vector.load %arg7[%c0_24, %c0_25, %c0_26] : memref<1x1x32xf32, #tpu.memory_space<vmem>>, vector<1x1x32xf32>
    %41 = vector.shape_cast %40 : vector<1x1x32xf32> to vector<1x32xf32>
    %42 = vector.broadcast %41 : vector<1x32xf32> to vector<16x32xf32>
    %43 = arith.addf %39, %42 : vector<16x32xf32>
    %c0_27 = arith.constant 0 : index
    %c0_28 = arith.constant 0 : index
    %c0_29 = arith.constant 0 : index
    %44 = vector.load %arg8[%c0_27, %c0_28, %c0_29] : memref<1x32x32xbf16, #tpu.memory_space<vmem>>, vector<1x32x32xbf16>
    %45 = vector.shape_cast %44 : vector<1x32x32xbf16> to vector<32x32xbf16>
    %cst_30 = arith.constant dense<0.000000e+00> : vector<16x32xf32>
    %46 = tpu.matmul %29, %45, %cst_30 {dimension_numbers = #tpu.dot_dimension_numbers<[1], [0], [0], [1], [0, 0, 1, 1], [], []>} : vector<16x32xbf16>, vector<32x32xbf16>, vector<16x32xf32> -> vector<16x32xf32>
    %c0_31 = arith.constant 0 : index
    %c0_32 = arith.constant 0 : index
    %c0_33 = arith.constant 0 : index
    %47 = vector.load %arg9[%c0_31, %c0_32, %c0_33] : memref<1x1x32xf32, #tpu.memory_space<vmem>>, vector<1x1x32xf32>
    %48 = vector.shape_cast %47 : vector<1x1x32xf32> to vector<1x32xf32>
    %49 = vector.broadcast %48 : vector<1x32xf32> to vector<16x32xf32>
    %50 = arith.addf %46, %49 : vector<16x32xf32>
    %51 = vector.shape_cast %36 : vector<16x32xf32> to vector<2x8x4x8xf32>
    %52 = tpu.transpose %51, [0, 2, 1, 3] : vector<2x8x4x8xf32> -> vector<2x4x8x8xf32>
    %53 = vector.shape_cast %52 : vector<2x4x8x8xf32> to vector<8x8x8xf32>
    %54 = arith.truncf %53 : vector<8x8x8xf32> to vector<8x8x8xbf16>
    %55 = vector.shape_cast %43 : vector<16x32xf32> to vector<2x8x4x8xf32>
    %56 = tpu.transpose %55, [0, 2, 1, 3] : vector<2x8x4x8xf32> -> vector<2x4x8x8xf32>
    %57 = vector.shape_cast %56 : vector<2x4x8x8xf32> to vector<8x8x8xf32>
    %58 = arith.truncf %57 : vector<8x8x8xf32> to vector<8x8x8xbf16>
    %59 = vector.shape_cast %50 : vector<16x32xf32> to vector<2x8x4x8xf32>
    %60 = tpu.transpose %59, [0, 2, 1, 3] : vector<2x8x4x8xf32> -> vector<2x4x8x8xf32>
    %61 = vector.shape_cast %60 : vector<2x4x8x8xf32> to vector<8x8x8xf32>
    %62 = arith.truncf %61 : vector<8x8x8xf32> to vector<8x8x8xbf16>
    "tpu.trace_start"() <{level = 10 : i32, message = "gsd,gtd->gst"}> : () -> ()
    %cst_34 = arith.constant dense<0.000000e+00> : vector<8x8x8xf32>
    %63 = tpu.matmul %54, %58, %cst_34 {dimension_numbers = #tpu.dot_dimension_numbers<[2], [2], [1], [1], [0, 0, 0, 1, 1, 1], [0], [0]>} : vector<8x8x8xbf16>, vector<8x8x8xbf16>, vector<8x8x8xf32> -> vector<8x8x8xf32>
    "tpu.trace_stop"() : () -> ()
    %cst_35 = arith.constant dense<0xFF800000> : vector<8x8xf32>
    %64 = vector.multi_reduction <maximumf>, %63, %cst_35 [2] : vector<8x8x8xf32> to vector<8x8xf32>
    %65 = vector.shape_cast %64 : vector<8x8xf32> to vector<8x8x1xf32>
    %66 = vector.broadcast %65 : vector<8x8x1xf32> to vector<8x8x8xf32>
    %67 = arith.subf %63, %66 : vector<8x8x8xf32>
    %68 = math.exp %67 : vector<8x8x8xf32>
    %cst_36 = arith.constant dense<0.000000e+00> : vector<8x8xf32>
    %69 = vector.multi_reduction <add>, %68, %cst_36 [2] : vector<8x8x8xf32> to vector<8x8xf32>
    %70 = vector.shape_cast %69 : vector<8x8xf32> to vector<8x8x1xf32>
    %71 = tpu.reciprocal %70 {approx = true} : vector<8x8x1xf32> -> vector<8x8x1xf32>
    %72 = vector.broadcast %71 : vector<8x8x1xf32> to vector<8x8x8xf32>
    %73 = arith.mulf %68, %72 : vector<8x8x8xf32>
    %74 = arith.truncf %73 : vector<8x8x8xf32> to vector<8x8x8xbf16>
    "tpu.trace_start"() <{level = 10 : i32, message = "gst,gtd->gsd"}> : () -> ()
    %cst_37 = arith.constant dense<0.000000e+00> : vector<8x8x8xf32>
    %75 = tpu.matmul %74, %62, %cst_37 {dimension_numbers = #tpu.dot_dimension_numbers<[2], [1], [1], [2], [0, 0, 0, 1, 1, 2], [0], [0]>} : vector<8x8x8xbf16>, vector<8x8x8xbf16>, vector<8x8x8xf32> -> vector<8x8x8xf32>
    "tpu.trace_stop"() : () -> ()
    %76 = vector.shape_cast %75 : vector<8x8x8xf32> to vector<2x4x8x8xf32>
    %77 = tpu.transpose %76, [0, 2, 1, 3] : vector<2x4x8x8xf32> -> vector<2x8x4x8xf32>
    %78 = vector.shape_cast %77 : vector<2x8x4x8xf32> to vector<16x32xf32>
    %79 = arith.truncf %78 : vector<16x32xf32> to vector<16x32xbf16>
    %c0_38 = arith.constant 0 : index
    %c0_39 = arith.constant 0 : index
    %c0_40 = arith.constant 0 : index
    %80 = vector.load %arg10[%c0_38, %c0_39, %c0_40] : memref<1x32x32xbf16, #tpu.memory_space<vmem>>, vector<1x32x32xbf16>
    %81 = vector.shape_cast %80 : vector<1x32x32xbf16> to vector<32x32xbf16>
    %cst_41 = arith.constant dense<0.000000e+00> : vector<16x32xf32>
    %82 = tpu.matmul %79, %81, %cst_41 {dimension_numbers = #tpu.dot_dimension_numbers<[1], [0], [0], [1], [0, 0, 1, 1], [], []>} : vector<16x32xbf16>, vector<32x32xbf16>, vector<16x32xf32> -> vector<16x32xf32>
    %c0_42 = arith.constant 0 : index
    %c0_43 = arith.constant 0 : index
    %c0_44 = arith.constant 0 : index
    %83 = vector.load %arg11[%c0_42, %c0_43, %c0_44] : memref<1x1x32xf32, #tpu.memory_space<vmem>>, vector<1x1x32xf32>
    %84 = vector.shape_cast %83 : vector<1x1x32xf32> to vector<1x32xf32>
    %85 = vector.broadcast %84 : vector<1x32xf32> to vector<16x32xf32>
    %86 = arith.addf %82, %85 : vector<16x32xf32>
    %87 = arith.addf %86, %4 : vector<16x32xf32>
    %c0_45 = arith.constant 0 : index
    %c0_46 = arith.constant 0 : index
    %c0_47 = arith.constant 0 : index
    %88 = vector.load %arg12[%c0_45, %c0_46, %c0_47] : memref<1x1x32xf32, #tpu.memory_space<vmem>>, vector<1x1x32xf32>
    %89 = vector.shape_cast %88 : vector<1x1x32xf32> to vector<1x32xf32>
    %c0_48 = arith.constant 0 : index
    %c0_49 = arith.constant 0 : index
    %c0_50 = arith.constant 0 : index
    %90 = vector.load %arg13[%c0_48, %c0_49, %c0_50] : memref<1x1x32xf32, #tpu.memory_space<vmem>>, vector<1x1x32xf32>
    %91 = vector.shape_cast %90 : vector<1x1x32xf32> to vector<1x32xf32>
    %cst_51 = arith.constant dense<0.000000e+00> : vector<16xf32>
    %92 = vector.multi_reduction <add>, %87, %cst_51 [1] : vector<16x32xf32> to vector<16xf32>
    %93 = vector.shape_cast %92 : vector<16xf32> to vector<16x1xf32>
    %cst_52 = arith.constant 3.200000e+01 : f32
    %94 = vector.broadcast %cst_52 : f32 to vector<16x1xf32>
    %95 = arith.divf %93, %94 : vector<16x1xf32>
    %96 = vector.broadcast %95 : vector<16x1xf32> to vector<16x32xf32>
    %97 = arith.subf %87, %96 : vector<16x32xf32>
    %98 = arith.mulf %97, %97 : vector<16x32xf32>
    %cst_53 = arith.constant dense<0.000000e+00> : vector<16xf32>
    %99 = vector.multi_reduction <add>, %98, %cst_53 [1] : vector<16x32xf32> to vector<16xf32>
    %100 = vector.shape_cast %99 : vector<16xf32> to vector<16x1xf32>
    %cst_54 = arith.constant 3.200000e+01 : f32
    %101 = vector.broadcast %cst_54 : f32 to vector<16x1xf32>
    %102 = arith.divf %100, %101 : vector<16x1xf32>
    %cst_55 = arith.constant 9.99999997E-7 : f32
    %103 = vector.broadcast %cst_55 : f32 to vector<16x1xf32>
    %104 = arith.addf %102, %103 : vector<16x1xf32>
    %105 = math.rsqrt %104 : vector<16x1xf32>
    %106 = vector.broadcast %105 : vector<16x1xf32> to vector<16x32xf32>
    %107 = arith.mulf %97, %106 : vector<16x32xf32>
    %108 = vector.broadcast %89 : vector<1x32xf32> to vector<16x32xf32>
    %109 = arith.mulf %107, %108 : vector<16x32xf32>
    %110 = vector.broadcast %91 : vector<1x32xf32> to vector<16x32xf32>
    %111 = arith.addf %109, %110 : vector<16x32xf32>
    %112 = arith.truncf %111 : vector<16x32xf32> to vector<16x32xbf16>
    %c0_56 = arith.constant 0 : index
    %c0_57 = arith.constant 0 : index
    %c0_58 = arith.constant 0 : index
    %113 = vector.load %arg14[%c0_56, %c0_57, %c0_58] : memref<1x32x64xbf16, #tpu.memory_space<vmem>>, vector<1x32x64xbf16>
    %114 = vector.shape_cast %113 : vector<1x32x64xbf16> to vector<32x64xbf16>
    %cst_59 = arith.constant dense<0.000000e+00> : vector<16x64xf32>
    %115 = tpu.matmul %112, %114, %cst_59 {dimension_numbers = #tpu.dot_dimension_numbers<[1], [0], [0], [1], [0, 0, 1, 1], [], []>} : vector<16x32xbf16>, vector<32x64xbf16>, vector<16x64xf32> -> vector<16x64xf32>
    %c0_60 = arith.constant 0 : index
    %c0_61 = arith.constant 0 : index
    %c0_62 = arith.constant 0 : index
    %116 = vector.load %arg15[%c0_60, %c0_61, %c0_62] : memref<1x1x64xf32, #tpu.memory_space<vmem>>, vector<1x1x64xf32>
    %117 = vector.shape_cast %116 : vector<1x1x64xf32> to vector<1x64xf32>
    %118 = vector.broadcast %117 : vector<1x64xf32> to vector<16x64xf32>
    %119 = arith.addf %115, %118 : vector<16x64xf32>
    %cst_63 = arith.constant 0.000000e+00 : f32
    %120 = vector.broadcast %cst_63 : f32 to vector<16x64xf32>
    %121 = arith.maximumf %119, %120 : vector<16x64xf32>
    %122 = arith.truncf %121 : vector<16x64xf32> to vector<16x64xbf16>
    %c0_64 = arith.constant 0 : index
    %c0_65 = arith.constant 0 : index
    %c0_66 = arith.constant 0 : index
    %123 = vector.load %arg16[%c0_64, %c0_65, %c0_66] : memref<1x64x32xbf16, #tpu.memory_space<vmem>>, vector<1x64x32xbf16>
    %124 = vector.shape_cast %123 : vector<1x64x32xbf16> to vector<64x32xbf16>
    %cst_67 = arith.constant dense<0.000000e+00> : vector<16x32xf32>
    %125 = tpu.matmul %122, %124, %cst_67 {dimension_numbers = #tpu.dot_dimension_numbers<[1], [0], [0], [1], [0, 0, 1, 1], [], []>} : vector<16x64xbf16>, vector<64x32xbf16>, vector<16x32xf32> -> vector<16x32xf32>
    %c0_68 = arith.constant 0 : index
    %c0_69 = arith.constant 0 : index
    %c0_70 = arith.constant 0 : index
    %126 = vector.load %arg17[%c0_68, %c0_69, %c0_70] : memref<1x1x32xf32, #tpu.memory_space<vmem>>, vector<1x1x32xf32>
    %127 = vector.shape_cast %126 : vector<1x1x32xf32> to vector<1x32xf32>
    %128 = vector.broadcast %127 : vector<1x32xf32> to vector<16x32xf32>
    %129 = arith.addf %125, %128 : vector<16x32xf32>
    %130 = arith.addf %87, %129 : vector<16x32xf32>
    %131 = vector.shape_cast %130 : vector<16x32xf32> to vector<2x8x32xf32>
    %c0_71 = arith.constant 0 : index
    %c0_72 = arith.constant 0 : index
    %c0_73 = arith.constant 0 : index
    %132 = vector.load %arg22[%c0_71, %c0_72, %c0_73] : memref<2x8x32xf32, #tpu.memory_space<vmem>>, vector<2x8x32xf32>
    tpu.vector_store %arg22[%c0_71, %c0_72, %c0_73], %131 {strides = array<i32>} : memref<2x8x32xf32, #tpu.memory_space<vmem>>, vector<2x8x32xf32>,
    %133 = vector.shape_cast %130 : vector<16x32xf32> to vector<1x2x8x32xf32>
    %c0_74 = arith.constant 0 : index
    %c0_75 = arith.constant 0 : index
    %c0_76 = arith.constant 0 : index
    %c0_77 = arith.constant 0 : index
    %134 = vector.load %arg20[%c0_74, %c0_75, %c0_76, %c0_77] : memref<1x2x8x32xf32, #tpu.memory_space<vmem>>, vector<1x2x8x32xf32>
    tpu.vector_store %arg20[%c0_74, %c0_75, %c0_76, %c0_77], %133 {strides = array<i32>} : memref<1x2x8x32xf32, #tpu.memory_space<vmem>>, vector<1x2x8x32xf32>,
    %c1_i32 = arith.constant 1 : i32
    %135 = arith.cmpi eq, %arg0, %c1_i32 : i32
    %136 = arith.extui %135 : i1 to i32
    %c0_i32_78 = arith.constant 0 : i32
    %137 = arith.cmpi ne, %136, %c0_i32_78 : i32
    scf.if %137 {
      %c0_79 = arith.constant 0 : index
      %c0_80 = arith.constant 0 : index
      %138 = vector.load %arg18[%c0_79, %c0_80] : memref<1x32xf32, #tpu.memory_space<vmem>>, vector<1x32xf32>
      %c0_81 = arith.constant 0 : index
      %c0_82 = arith.constant 0 : index
      %139 = vector.load %arg19[%c0_81, %c0_82] : memref<1x32xf32, #tpu.memory_space<vmem>>, vector<1x32xf32>
      %cst_83 = arith.constant dense<0.000000e+00> : vector<16xf32>
      %140 = vector.multi_reduction <add>, %130, %cst_83 [1] : vector<16x32xf32> to vector<16xf32>
      %141 = vector.shape_cast %140 : vector<16xf32> to vector<16x1xf32>
      %cst_84 = arith.constant 3.200000e+01 : f32
      %142 = vector.broadcast %cst_84 : f32 to vector<16x1xf32>
      %143 = arith.divf %141, %142 : vector<16x1xf32>
      %144 = vector.broadcast %143 : vector<16x1xf32> to vector<16x32xf32>
      %145 = arith.subf %130, %144 : vector<16x32xf32>
      %146 = arith.mulf %145, %145 : vector<16x32xf32>
      %cst_85 = arith.constant dense<0.000000e+00> : vector<16xf32>
      %147 = vector.multi_reduction <add>, %146, %cst_85 [1] : vector<16x32xf32> to vector<16xf32>
      %148 = vector.shape_cast %147 : vector<16xf32> to vector<16x1xf32>
      %cst_86 = arith.constant 3.200000e+01 : f32
      %149 = vector.broadcast %cst_86 : f32 to vector<16x1xf32>
      %150 = arith.divf %148, %149 : vector<16x1xf32>
      %cst_87 = arith.constant 9.99999997E-7 : f32
      %151 = vector.broadcast %cst_87 : f32 to vector<16x1xf32>
      %152 = arith.addf %150, %151 : vector<16x1xf32>
      %153 = math.rsqrt %152 : vector<16x1xf32>
      %154 = vector.broadcast %153 : vector<16x1xf32> to vector<16x32xf32>
      %155 = arith.mulf %145, %154 : vector<16x32xf32>
      %156 = vector.broadcast %138 : vector<1x32xf32> to vector<16x32xf32>
      %157 = arith.mulf %155, %156 : vector<16x32xf32>
      %158 = vector.broadcast %139 : vector<1x32xf32> to vector<16x32xf32>
      %159 = arith.addf %157, %158 : vector<16x32xf32>
      %160 = vector.shape_cast %159 : vector<16x32xf32> to vector<2x8x32xf32>
      %c0_88 = arith.constant 0 : index
      %c0_89 = arith.constant 0 : index
      %c0_90 = arith.constant 0 : index
      %161 = vector.load %arg21[%c0_88, %c0_89, %c0_90] : memref<2x8x32xf32, #tpu.memory_space<vmem>>, vector<2x8x32xf32>
      tpu.vector_store %arg21[%c0_88, %c0_89, %c0_90], %160 {strides = array<i32>} : memref<2x8x32xf32, #tpu.memory_space<vmem>>, vector<2x8x32xf32>,
    } else {
    }
    return
  }
  func.func @transform_0(%arg0: i32) -> (i32, i32, i32) {
    %c0_i32 = arith.constant 0 : i32
    %c0_i32_0 = arith.constant 0 : i32
    %c0_i32_1 = arith.constant 0 : i32
    %c0_i32_2 = arith.constant 0 : i32
    return %c0_i32, %c0_i32_0, %c0_i32_1 : i32, i32, i32
  }
  func.func @transform_1(%arg0: i32) -> (i32, i32, i32) {
    %c0_i32 = arith.constant 0 : i32
    %c0_i32_0 = arith.constant 0 : i32
    %c0_i32_1 = arith.constant 0 : i32
    return %arg0, %c0_i32, %c0_i32_0 : i32, i32, i32
  }
  func.func @transform_2(%arg0: i32) -> (i32, i32, i32) {
    %c0_i32 = arith.constant 0 : i32
    %c0_i32_0 = arith.constant 0 : i32
    %c0_i32_1 = arith.constant 0 : i32
    return %arg0, %c0_i32, %c0_i32_0 : i32, i32, i32
  }
  func.func @transform_3(%arg0: i32) -> (i32, i32, i32) {
    %c0_i32 = arith.constant 0 : i32
    %c0_i32_0 = arith.constant 0 : i32
    %c0_i32_1 = arith.constant 0 : i32
    return %arg0, %c0_i32, %c0_i32_0 : i32, i32, i32
  }
  func.func @transform_4(%arg0: i32) -> (i32, i32, i32) {
    %c0_i32 = arith.constant 0 : i32
    %c0_i32_0 = arith.constant 0 : i32
    %c0_i32_1 = arith.constant 0 : i32
    return %arg0, %c0_i32, %c0_i32_0 : i32, i32, i32
  }
  func.func @transform_5(%arg0: i32) -> (i32, i32, i32) {
    %c0_i32 = arith.constant 0 : i32
    %c0_i32_0 = arith.constant 0 : i32
    %c0_i32_1 = arith.constant 0 : i32
    return %arg0, %c0_i32, %c0_i32_0 : i32, i32, i32
  }
  func.func @transform_6(%arg0: i32) -> (i32, i32, i32) {
    %c0_i32 = arith.constant 0 : i32
    %c0_i32_0 = arith.constant 0 : i32
    %c0_i32_1 = arith.constant 0 : i32
    return %arg0, %c0_i32, %c0_i32_0 : i32, i32, i32
  }
  func.func @transform_7(%arg0: i32) -> (i32, i32, i32) {
    %c0_i32 = arith.constant 0 : i32
    %c0_i32_0 = arith.constant 0 : i32
    %c0_i32_1 = arith.constant 0 : i32
    return %arg0, %c0_i32, %c0_i32_0 : i32, i32, i32
  }
  func.func @transform_8(%arg0: i32) -> (i32, i32, i32) {
    %c0_i32 = arith.constant 0 : i32
    %c0_i32_0 = arith.constant 0 : i32
    %c0_i32_1 = arith.constant 0 : i32
    return %arg0, %c0_i32, %c0_i32_0 : i32, i32, i32
  }
  func.func @transform_9(%arg0: i32) -> (i32, i32, i32) {
    %c0_i32 = arith.constant 0 : i32
    %c0_i32_0 = arith.constant 0 : i32
    %c0_i32_1 = arith.constant 0 : i32
    return %arg0, %c0_i32, %c0_i32_0 : i32, i32, i32
  }
  func.func @transform_10(%arg0: i32) -> (i32, i32, i32) {
    %c0_i32 = arith.constant 0 : i32
    %c0_i32_0 = arith.constant 0 : i32
    %c0_i32_1 = arith.constant 0 : i32
    return %arg0, %c0_i32, %c0_i32_0 : i32, i32, i32
  }
  func.func @transform_11(%arg0: i32) -> (i32, i32, i32) {
    %c0_i32 = arith.constant 0 : i32
    %c0_i32_0 = arith.constant 0 : i32
    %c0_i32_1 = arith.constant 0 : i32
    return %arg0, %c0_i32, %c0_i32_0 : i32, i32, i32
  }
  func.func @transform_12(%arg0: i32) -> (i32, i32, i32) {
    %c0_i32 = arith.constant 0 : i32
    %c0_i32_0 = arith.constant 0 : i32
    %c0_i32_1 = arith.constant 0 : i32
    return %arg0, %c0_i32, %c0_i32_0 : i32, i32, i32
  }
  func.func @transform_13(%arg0: i32) -> (i32, i32, i32) {
    %c0_i32 = arith.constant 0 : i32
    %c0_i32_0 = arith.constant 0 : i32
    %c0_i32_1 = arith.constant 0 : i32
    return %arg0, %c0_i32, %c0_i32_0 : i32, i32, i32
  }
  func.func @transform_14(%arg0: i32) -> (i32, i32, i32) {
    %c0_i32 = arith.constant 0 : i32
    %c0_i32_0 = arith.constant 0 : i32
    %c0_i32_1 = arith.constant 0 : i32
    return %arg0, %c0_i32, %c0_i32_0 : i32, i32, i32
  }
  func.func @transform_15(%arg0: i32) -> (i32, i32, i32) {
    %c0_i32 = arith.constant 0 : i32
    %c0_i32_0 = arith.constant 0 : i32
    %c0_i32_1 = arith.constant 0 : i32
    return %arg0, %c0_i32, %c0_i32_0 : i32, i32, i32
  }
  func.func @transform_16(%arg0: i32) -> (i32, i32, i32) {
    %c0_i32 = arith.constant 0 : i32
    %c0_i32_0 = arith.constant 0 : i32
    %c0_i32_1 = arith.constant 0 : i32
    return %arg0, %c0_i32, %c0_i32_0 : i32, i32, i32
  }
  func.func @transform_17(%arg0: i32) -> (i32, i32) {
    %c0_i32 = arith.constant 0 : i32
    %c0_i32_0 = arith.constant 0 : i32
    %c0_i32_1 = arith.constant 0 : i32
    return %c0_i32, %c0_i32_0 : i32, i32
  }
  func.func @transform_18(%arg0: i32) -> (i32, i32) {
    %c0_i32 = arith.constant 0 : i32
    %c0_i32_0 = arith.constant 0 : i32
    %c0_i32_1 = arith.constant 0 : i32
    return %c0_i32, %c0_i32_0 : i32, i32
  }
  func.func @transform_19(%arg0: i32) -> (i32, i32, i32, i32) {
    %c0_i32 = arith.constant 0 : i32
    %c0_i32_0 = arith.constant 0 : i32
    %c0_i32_1 = arith.constant 0 : i32
    %c0_i32_2 = arith.constant 0 : i32
    return %arg0, %c0_i32, %c0_i32_0, %c0_i32_1 : i32, i32, i32, i32
  }
  func.func @transform_20(%arg0: i32) -> (i32, i32, i32) {
    %c0_i32 = arith.constant 0 : i32
    %c0_i32_0 = arith.constant 0 : i32
    %c0_i32_1 = arith.constant 0 : i32
    %c0_i32_2 = arith.constant 0 : i32
    return %c0_i32, %c0_i32_0, %c0_i32_1 : i32, i32, i32
  }
}

</mosaic_0001>

<bundles_post_ra>
// kernel: tpu_custom_call.1
= control target key start
LH: loop header
LB: loop body
LE: loop exit
PB: predicated region body
PF: predicated region fallthrough
CT: control target
= control target key end

     0   :  { %s4853_s0 = inlined_call_operand.hbm [shape: f32[2,8,32], index: 0, kind: input, shape index: {}]   ;;  %s4854_s1 = inlined_call_operand.hbm [shape: f32[2,1,32], index: 1, kind: input, shape index: {}]   ;;  %s4855_s2 = inlined_call_operand.hbm [shape: f32[2,1,32], index: 2, kind: input, shape index: {}]   ;;  %s4856_s3 = inlined_call_operand.vmem [shape: bf16[2,32,32], index: 3, kind: input, shape index: {}]   ;;  %s4857_s4 = inlined_call_operand.vmem [shape: f32[2,1,32], index: 4, kind: input, shape index: {}]   ;;  %s4858_s5 = inlined_call_operand.vmem [shape: bf16[2,32,32], index: 5, kind: input, shape index: {}]   ;;  %s4859_s6 = inlined_call_operand.vmem [shape: f32[2,1,32], index: 6, kind: input, shape index: {}]   ;;  %s4860_s7 = inlined_call_operand.vmem [shape: bf16[2,32,32], index: 7, kind: input, shape index: {}]   ;;  %s4861_s8 = inlined_call_operand.vmem [shape: f32[2,1,32], index: 8, kind: input, shape index: {}]   ;;  %s4862_s9 = inlined_call_operand.hbm [shape: bf16[2,32,32], index: 9, kind: input, shape index: {}]   ;;  %s4863_s10 = inlined_call_operand.vmem [shape: f32[2,1,32], index: 10, kind: input, shape index: {}]   ;;  %s4864_s11 = inlined_call_operand.hbm [shape: f32[2,1,32], index: 11, kind: input, shape index: {}]   ;;  %s4865_s12 = inlined_call_operand.vmem [shape: f32[2,1,32], index: 12, kind: input, shape index: {}]   ;;  %s4866_s13 = inlined_call_operand.hbm [shape: bf16[2,32,64], index: 13, kind: input, shape index: {}]   ;;  %s4867_s14 = inlined_call_operand.vmem [shape: f32[2,1,64], index: 14, kind: input, shape index: {}]   ;;  %s4868_s15 = inlined_call_operand.vmem [shape: bf16[2,64,32], index: 15, kind: input, shape index: {}]   ;;  %s4869_s16 = inlined_call_operand.vmem [shape: f32[2,1,32], index: 16, kind: input, shape index: {}]   ;;  %s4870_s17 = inlined_call_operand.vmem [shape: f32[1,32], index: 17, kind: input, shape index: {}]   ;;  %s4871_s18 = inlined_call_operand.vmem [shape: f32[1,32], index: 18, kind: input, shape index: {}]   ;;  %s4872_s19 = inlined_call_operand.hbm [shape: f32[2,2,8,32], index: 19, kind: output, shape index: {0}]   ;;  %s4873_s20 = inlined_call_operand.hbm [shape: f32[2,8,32], index: 20, kind: output, shape index: {1}]  }
   0x1   :  { %4890 = sst [smem:[#allocation30_spill]] %s4853_s0 }
   0x2   :  { %4891 = sst [smem:[#allocation31_spill]] %s4854_s1 }
   0x3   :  { %4892 = sst [smem:[#allocation32_spill]] %s4855_s2 }
   0x4   :  { %4893 = sst [smem:[#allocation33_spill]] %s4856_s3 }
   0x5   :  { %4894 = sst [smem:[#allocation34_spill]] %s4857_s4 }
   0x6   :  { %4895 = sst [smem:[#allocation35_spill]] %s4858_s5 }
   0x7   :  { %4896 = sst [smem:[#allocation36_spill]] %s4860_s7 }
   0x8   :  { %4897 = sst [smem:[#allocation37_spill]] %s4861_s8 }
   0x9   :  { %4898 = sst [smem:[#allocation38_spill]] %s4862_s9 }
   0xa   :  { %4899 = sst [smem:[#allocation39_spill]] %s4863_s10 }
   0xb   :  { %4900 = sst [smem:[#allocation40_spill]] %s4864_s11 }
   0xc   :  { %4901 = sst [smem:[#allocation41_spill]] %s4865_s12 }
   0xd   :  { %4902 = sst [smem:[#allocation42_spill]] %s4866_s13 }
   0xe   :  { %4903 = sst [smem:[#allocation43_spill]] %s4867_s14 }
   0xf   :  { %4904 = sst [smem:[#allocation44_spill]] %s4868_s15 }
  0x10   :  { %4905 = sst [smem:[#allocation45_spill]] %s4869_s16 }
  0x11   :  { %4906 = sst [smem:[#allocation46_spill]] %s4870_s17 }
  0x12   :  { %4907 = sst [smem:[#allocation47_spill]] %s4871_s18 }
  0x13   :  { %4908 = sst [smem:[#allocation48_spill]] %s4872_s19 }
  0x14   :  { %4909 = sst [smem:[#allocation49_spill]] %s4873_s20 }
  0x15   :  { %26 = vsyncpa [#allocation4], 0 }
  0x16   :  { %27 = vsyncpa [#allocation7], 0 }
  0x17   :  { %29 = vsyncpa [#allocation7 + $0x1], 0 }
  0x18   :  { %30 = vsyncpa [#allocation10], 0 }
  0x19   :  { %32 = vsyncpa [#allocation10 + $0x1], 0 }
  0x1a   :  { %33 = vsyncpa [#allocation13], 0 }
  0x1b   :  { %35 = vsyncpa [#allocation13 + $0x1], 0 }
  0x1c   :  { %36 = vsyncpa [#allocation5], 0 }
  0x1d   :  { %38 = vsyncpa [#allocation5 + $0x1], 0 }
  0x1e   :  { %39 = vsyncpa [#allocation16], 0  ;;  %s3874_s1 = smov 0   ;;  %s3876_s22 = smov 0  }
  0x1f   :  { %s3878_s23 = smov 0   ;;  %s3880_s24 = smov 0  }
  0x20 LB: > { %4910 = sst [smem:[#allocation23_spill]] %s3739_s1  ;;  %s3895_s2 = sadd.s32 1, %s3751_s24   ;;  %s3751_s24 = sphi %s3880_s24, %s4974_s24   ;;  %s3747_s23 = sphi %s3878_s23, %s4977_s23   ;;  %s3743_s22 = sphi %s3876_s22, %s4976_s22   ;;  %s3739_s1 = sphi %s3874_s1, %s4975_s1  }
  0x21   : > { %4911 = sst [smem:[#allocation24_spill]] %s3743_s22  ;;  %s73_s25 = sadd.s32 1, %s3747_s23 }
  0x22   : > { %4912 = sst [smem:[#allocation25_spill]] %s3747_s23  ;;  %s70_s3 = ssub.s32 %s3751_s24, %s3895_s2 }
  0x23   : > { %4913 = sst [smem:[#allocation26_spill]] %s3895_s2  ;;  %p80_p0 = scmp.ne.s32.totalorder %s3747_s23, %s3743_s22 }
  0x24   : > { %p71_p1 = scmp.eq.s32.totalorder %s70_s3, 0  ;;  %p81_p2 = scmp.eq.s32.totalorder %s3751_s24, 0 }
  0x25   : > { %p3313_p4 = scmp.lt.s32.totalorder %s3751_s24, 2  ;;  %s3913_s28 = sand.u32 1, %s3747_s23  }
  0x26   : > { %s3906_s26 = scalar_select %p71_p1, %s3747_s23, %s73_s25  }
  0x27   : > { %p82_p5 = por %p81_p2, %p80_p0  ;;  %s4915_s30 = sld [smem:[#allocation31_spill]] }
  0x28   : > { %4914 = sst [smem:[#allocation27_spill]] %s3906_s26  ;;  %s612_s3 = scalar_lea.vmem [#allocation6], %s3913_s28 }
  0x29   : > { %s619_s2 = sshll.u32 %s612_s3, 4  ;;  %p3920_p6 = pnand %p3313_p4, %p82_p5  ;;  %s620_s2 = int_to_ptr.vmem [resolvable:$true] %s619_s2 }
  0x2a   : > { %s4917_s26 = sand.u32 1, %s3751_s24  }
  0x2b   : > { %s3928_s19 = scalar_lea.sflag [#allocation7], %s4917_s26  ;;  %p3932_p8 = pneg %p3920_p6 }
  0x2d   : > { %s615_s0 = scalar_lea.hbm %s4915_s30, %s3751_s24  ;;  %s3468_s25 = scalar_lea.hbm %s4915_s30, 2 }
  0x2e   : > { %s617_s21 = sshll.u32 %s615_s0, 4  ;;  %s618_s21 = int_to_ptr.hbm [resolvable:$true] %s617_s21 }
  0x2f   : > { %s3461_s18 = sshra.s32 %s618_s21, 4  ;;  %s3462_s18 = int_to_ptr.hbm [resolvable:$true] %s3461_s18 }
  0x30   : > { %s3463_s4 = scalar_lea.hbm %s3462_s18, 1  ;;  %p3469_p11 = scmp.lt.s32.totalorder %s3462_s18, %s4915_s30 }
  0x31   : > { %p3464_p7 = scmp.ne.s32.totalorder %s3462_s18, %s3463_s4  ;;  %p3470_p12 = scmp.lt.s32.totalorder %s3468_s25, %s3463_s4 }
  0x33   : > { %p3466_p9 = pnand %p3932_p8, %p3464_p7  ;;  %p3471_p13 = por %p3470_p12, %p3469_p11 }
  0x35   : > { %p3467_p10 = pneg %p3466_p9 }
  0x37   : > { %p3472_p1 = pnand %p3471_p13, %p3467_p10 }
  0x39   : > { %3475 = shalt.err (!%p3472_p1)
}
  0x3a   : > { %3295 = dma.hbm_to_vmem [thread:$0]  (!%p3920_p6), %s618_s21, 16, %s620_s2, %s3928_s19  }
  0x3b   : > { %s4919_s17 = sshll.u32 %s3751_s24, 4  ;;  %s4920_s9 = sld [smem:[#allocation38_spill]] }
  0x3c   : > { %s4921_s16 = sshll.u32 %s3913_s28, 4  ;;  %s4922_s4 = sand.u32 1, %s3751_s24  }
  0x3d   : > { %s689_s27 = scalar_lea.vmem [#allocation9], %s4921_s16  ;;  %s3956_s26 = scalar_lea.sflag [#allocation10], %s4922_s4 }
  0x3e   : > { %s697_s18 = sshll.u32 %s689_s27, 4  ;;  %s698_s18 = int_to_ptr.vmem [resolvable:$true] %s697_s18 }
  0x41   : > { %s694_s3 = scalar_lea.hbm %s4920_s9, %s4919_s17  ;;  %s3498_s15 = scalar_lea.hbm %s4920_s9, 32 }
  0x42   : > { %s695_s25 = sshll.u32 %s694_s3, 4  ;;  %s696_s25 = int_to_ptr.hbm [resolvable:$true] %s695_s25 }
  0x43   : > { %s3491_s30 = sshra.s32 %s696_s25, 4  ;;  %s3492_s30 = int_to_ptr.hbm [resolvable:$true] %s3491_s30 }
  0x44   : > { %s3493_s14 = scalar_lea.hbm %s3492_s30, 16  ;;  %p3499_p7 = scmp.lt.s32.totalorder %s3492_s30, %s4920_s9 }
  0x45   : > { %p3494_p2 = scmp.ne.s32.totalorder %s3492_s30, %s3493_s14  ;;  %p3500_p9 = scmp.lt.s32.totalorder %s3498_s15, %s3493_s14 }
  0x47   : > { %p3496_p4 = pnand %p3494_p2, %p3932_p8  ;;  %p3501_p10 = por %p3500_p9, %p3499_p7 }
  0x49   : > { %p3497_p5 = pneg %p3496_p4 }
  0x4b   : > { %p3502_p11 = pnand %p3501_p10, %p3497_p5 }
  0x4d   : > { %3505 = shalt.err (!%p3502_p11)
}
  0x4e   : > { %s4880_s0 = smov 64   ;;  %s4881_s3 = smov 4  }
  0x4f   : > { %3301 = dma.hbm_to_vmem [thread:$0]  (!%p3920_p6), %s696_s25, 256, %s698_s18, %s3956_s26, %s4880_s0, %s4880_s0, %s4881_s3  }
  0x50   : > { %s3973_s14 = sadd.s32 4294967295, %s3751_s24   ;;  %s3137_s30 = sadd.s32 4294967294, %s3751_s24  }
  0x51   : > { %p86_p12 = scmp.ne.s32.totalorder %s3743_s22, %s3739_s1  ;;  %p87_p13 = scmp.eq.s32.totalorder %s3973_s14, 0 }
  0x52   : > { %p4887_p1 = scmp.eq.s32.totalorder %s3973_s14, 1  ;;  %p548_p2 = scmp.eq.s32.totalorder %s3137_s30, 1 }
  0x53   : > { %p3138_p4 = scmp.ge.s32.totalorder %s3751_s24, 1  ;;  %p3983_p5 = por %p87_p13, %p86_p12 }
  0x54   : > { %p3992_p7 = por %p4887_p1, %p80_p0  ;;  %p3996_p9 = por %p548_p2, %p86_p12 }
  0x55   : > { %p576_p10 = scmp.lt.s32.totalorder %s3751_s24, 3  ;;  %s4928_s21 = sld [smem:[#allocation30_spill]] }
  0x56   : > { %s4924_s18 = scalar_select %p3992_p7, 1, 0 }
  0x57   : > { %s4926_s25 = scalar_select %p3996_p9, 1, 0 }
  0x58   : > { %4925 = sst [smem:[#allocation28_spill]] %s4924_s18  ;;  %p4005_p3 = pnand %p3138_p4, %p576_p10 }
  0x59   : > { %4927 = sst [smem:[#allocation29_spill]] %s4926_s25  ;;  %s3755_s16 = smov [#allocation3]  }
  0x5a   : > { %p3288_p0 = pneg %p4005_p3  ;;  %s589_s30 = sshll.u32 %s3755_s16, 4  ;;  %s590_s30 = int_to_ptr.vmem [resolvable:$true] %s589_s30 }
  0x5b   : > { %s587_s15 = sshll.u32 %s4928_s21, 4  ;;  %s4930_s9 = sld [smem:[#allocation32_spill]]  ;;  %s588_s15 = int_to_ptr.hbm [resolvable:$true] %s587_s15 }
  0x5c   : > { %p3289_p12 = pnand %p3288_p0, %p87_p13  ;;  %s629_s4 = scalar_lea.vmem [#allocation8], %s3913_s28 }
  0x5d   : > { %s636_s2 = sshll.u32 %s629_s4, 4  ;;  %s3756_s25 = smov 128   ;;  %s637_s2 = int_to_ptr.vmem [resolvable:$true] %s636_s2 }
  0x5e   : > { %s3757_s1 = smov 8  }
  0x5f   : > { %3291 = dma.hbm_to_vmem [thread:$0]  (!%p3289_p12), %s588_s15, 256, %s590_s30, [#allocation4], %s3756_s25, %s3756_s25, %s3757_s1  }
  0x61   : > { %s632_s23 = scalar_lea.hbm %s4930_s9, %s3751_s24  ;;  %s3558_s0 = scalar_lea.hbm %s4930_s9, 2 }
  0x62   : > { %s634_s21 = sshll.u32 %s632_s23, 4  ;;  %s635_s21 = int_to_ptr.hbm [resolvable:$true] %s634_s21 }
  0x63   : > { %s3551_s18 = sshra.s32 %s635_s21, 4  ;;  %s3552_s18 = int_to_ptr.hbm [resolvable:$true] %s3551_s18 }
  0x64   : > { %s3553_s12 = scalar_lea.hbm %s3552_s18, 1  ;;  %p3559_p0 = scmp.lt.s32.totalorder %s3552_s18, %s4930_s9 }
  0x65   : > { %p3554_p2 = scmp.ne.s32.totalorder %s3552_s18, %s3553_s12  ;;  %p3560_p1 = scmp.lt.s32.totalorder %s3558_s0, %s3553_s12 }
  0x67   : > { %p3556_p4 = pnand %p3554_p2, %p3932_p8  ;;  %p3561_p11 = por %p3560_p1, %p3559_p0 }
  0x69   : > { %p3557_p10 = pneg %p3556_p4 }
  0x6b   : > { %p3562_p12 = pnand %p3561_p11, %p3557_p10 }
  0x6d   : > { %3565 = shalt.err (!%p3562_p12)
}
  0x6e   : > { %3298 = dma.hbm_to_vmem [thread:$0]  (!%p3920_p6), %s635_s21, 16, %s637_s2, %s3928_s19  }
  0x6f   : > { %s4931_s11 = sld [smem:[#allocation40_spill]]  ;;  %s716_s15 = scalar_lea.vmem [#allocation11], %s3913_s28 }
  0x70   : > { %s723_s30 = sshll.u32 %s716_s15, 4  ;;  %s724_s30 = int_to_ptr.vmem [resolvable:$true] %s723_s30 }
  0x75   : > { %s719_s10 = scalar_lea.hbm %s4931_s11, %s3751_s24  ;;  %s3588_s19 = scalar_lea.hbm %s4931_s11, 2 }
  0x76   : > { %s721_s25 = sshll.u32 %s719_s10, 4  ;;  %s722_s25 = int_to_ptr.hbm [resolvable:$true] %s721_s25 }
  0x77   : > { %s3581_s8 = sshra.s32 %s722_s25, 4  ;;  %s3582_s8 = int_to_ptr.hbm [resolvable:$true] %s3581_s8 }
  0x78   : > { %s3583_s12 = scalar_lea.hbm %s3582_s8, 1  ;;  %p3589_p4 = scmp.lt.s32.totalorder %s3582_s8, %s4931_s11 }
  0x79   : > { %p3584_p1 = scmp.ne.s32.totalorder %s3582_s8, %s3583_s12  ;;  %p3590_p10 = scmp.lt.s32.totalorder %s3588_s19, %s3583_s12 }
  0x7b   : > { %p3586_p11 = pnand %p3584_p1, %p3932_p8  ;;  %p3591_p0 = por %p3590_p10, %p3589_p4 }
  0x7d   : > { %p3587_p2 = pneg %p3586_p11 }
  0x7f   : > { %p3592_p12 = pnand %p3591_p0, %p3587_p2 }
  0x81   : > { %3595 = shalt.err (!%p3592_p12)
}
  0x82   : > { %3304 = dma.hbm_to_vmem [thread:$0]  (!%p3920_p6), %s722_s25, 16, %s724_s30, %s3956_s26  }
  0x83   : > { %s4932_s16 = sshll.u32 %s3751_s24, 4  ;;  %s4933_s13 = sld [smem:[#allocation42_spill]] }
  0x84   : > { %s4934_s23 = sshll.u32 %s3913_s28, 4  ;;  %s737_s12 = scalar_lea.sflag [#allocation13], %s3913_s28 }
  0x85   : > { %s740_s10 = scalar_lea.vmem [#allocation12], %s4934_s23 }
  0x86   : > { %s748_s15 = sshll.u32 %s740_s10, 4  ;;  %s749_s15 = int_to_ptr.vmem [resolvable:$true] %s748_s15 }
  0x89   : > { %s745_s1 = scalar_lea.hbm %s4933_s13, %s4932_s16  ;;  %s3618_s30 = scalar_lea.hbm %s4933_s13, 32 }
  0x8a   : > { %s746_s8 = sshll.u32 %s745_s1, 4  ;;  %s747_s8 = int_to_ptr.hbm [resolvable:$true] %s746_s8 }
  0x8b   : > { %s3611_s18 = sshra.s32 %s747_s8, 4  ;;  %s3612_s18 = int_to_ptr.hbm [resolvable:$true] %s3611_s18 }
  0x8c   : > { %s3613_s4 = scalar_lea.hbm %s3612_s18, 16  ;;  %p3619_p4 = scmp.lt.s32.totalorder %s3612_s18, %s4933_s13 }
  0x8d   : > { %p3614_p1 = scmp.ne.s32.totalorder %s3612_s18, %s3613_s4  ;;  %p3620_p10 = scmp.lt.s32.totalorder %s3618_s30, %s3613_s4 }
  0x8f   : > { %p3616_p11 = pnand %p3614_p1, %p3932_p8  ;;  %p3621_p0 = por %p3620_p10, %p3619_p4 }
  0x91   : > { %p3617_p2 = pneg %p3616_p11 }
  0x93   : > { %p3622_p12 = pnand %p3621_p0, %p3617_p2 }
  0x95   : > { %3625 = shalt.err (!%p3622_p12)
}
  0x96   : > { %s4935_s28 = smov 4   ;;  %s4936_s21 = smov 64  }
  0x97   : > { %3307 = dma.hbm_to_vmem [thread:$0]  (!%p3920_p6), %s747_s8, 256, %s749_s15, %s737_s12, %s4936_s21, %s4936_s21, %s4935_s28  }
  0x98   : > { %780 = sbr.rel (%p4005_p3) target bundleno = 2455 (0x997), region = 96 }
  0x9d   : > { %3714 = dma.done.wait (%p87_p13), [#allocation4], 256  }
  0x9e   : > { %3716 = vsyncadd (%p87_p13), [#allocation4], 4294967040  ;;  %s787_s29 = sand.u32 1, %s3973_s14   ;;  %s4074_s16 = sand.u32 1, %s3743_s22  }
  0x9f   : > { %s788_s20 = scalar_lea.sflag [#allocation7], %s787_s29 }
  0xa0   : > { %3718 = dma.done.wait (%p3983_p5), %s788_s20, 32  }
  0xa1   : > { %3720 = vsyncadd (%p3983_p5), %s788_s20, 4294967264  ;;  %s4082_s17 = sshll.u32 %s4074_s16, 4  ;;  %s806_s1 = scalar_lea.sflag [#allocation10], %s787_s29 }
  0xa2   : > { %3722 = dma.done.wait (%p3983_p5), %s806_s1, 272  }
  0xa3   : > { %3724 = vsyncadd (%p3983_p5), %s806_s1, 4294967024  ;;  %s825_s15 = scalar_lea.sflag [#allocation13], %s4074_s16 }
  0xa4   : > { %3726 = dma.done.wait (%p3983_p5), %s825_s15, 256  }
  0xa5   : > { %3728 = vsyncadd (%p3983_p5), %s825_s15, 4294967040  ;;  %p944_p3 = scmp.lt.s32.totalorder %s3973_s14, 1  ;;  %s4938_s2 = sld [smem:[#allocation33_spill]] }
  0xa6   : > { %s4939_s5 = sld [smem:[#allocation35_spill]]  ;;  %s4152_s19 = scalar_lea.vmem [#allocation14], %s4082_s17 }
  0xa7   : > { %s4099_s12 = scalar_select %p944_p3, %s3973_s14, 1 }
  0xa8   : > { %s4940_s7 = sld [smem:[#allocation36_spill]]  ;;  %p4947_p6 = scmp.ne.s32.totalorder %s3973_s14, 0 }
  0xa9   : > { %s3249_s18 = sshll.u32 %s4099_s12, 4  ;;  %s4941_s27 = sld [smem:[#allocation37_spill]] }
  0xaa   : > { %s4942_s25 = sld [smem:[#allocation39_spill]]  ;;  %s3252_s13 = sshll.u32 %s4099_s12, 5 }
  0xab   : > { %s4109_s28 = scalar_lea.vmem %s4938_s2, %s3249_s18  ;;  %s4944_s15 = sld [smem:[#allocation43_spill]] }
  0xac   : > { %s4114_s20 = scalar_lea.vmem %s4939_s5, %s3249_s18  ;;  %s4943_s5 = sld [smem:[#allocation41_spill]] }
  0xad   : > { %s4946_s26 = sld [smem:[#allocation44_spill]] }
  0xae   : > { %s4123_s3 = scalar_lea.vmem %s4940_s7, %s3249_s18  ;;  %s4945_s18 = sld [smem:[#allocation45_spill]] }
  0xaf   : > { %s967_s30 = scalar_lea.vmem %s4941_s27, %s4099_s12 }
  0xb0   : > { %s970_s0 = scalar_lea.vmem %s4942_s25, %s4099_s12  ;;  %989 = sbr.rel (%p4947_p6) target bundleno = 184 (0xb8), region = 124 }
  0xb1   : > { %s976_s10 = scalar_lea.vmem %s4944_s15, %s4099_s12 }
  0xb2   : > { %s973_s9 = scalar_lea.vmem %s4943_s5, %s4099_s12 }
  0xb3   : > { %s4149_s27 = scalar_lea.vmem %s4946_s26, %s3252_s13 }
  0xb4   : > { %s984_s7 = scalar_lea.vmem %s4945_s18, %s4099_s12 }
  0xb5   : > { %v990_v0 = vld [vmem:[#allocation3] sm:$0xff]  ;;  %vm992_vm0 = vcmask 261120   ;;  %v991_v1 = vld [vmem:[#allocation3 + $0x8] sm:$0xff] }
  0xb6   : > { %993 = vst.msk [vmem:[#allocation2] sm:$0xff] %vm992_vm0, %v990_v0 }
  0xb7   : > { %994 = vst.msk [vmem:[#allocation2 + $0x8] sm:$0xff] %vm992_vm0, %v991_v1 }
  0xb8 PF: > { %vm999_vm1 = vcmask 261120   ;;  %v3758_v6 = vmov 32.0   ;;  %v3254_v23 = vld [vmem:[%s4109_s28 + $0x8] sm:$0xff]  ;;  %v3253_v27 = vld [vmem:[%s4109_s28] sm:$0xff]  ;;  %s4948_s5 = scalar_lea.vmem [#allocation6], %s4074_s16  ;;  %s4949_s11 = scalar_lea.vmem [#allocation8], %s4074_s16 }
  0xb9   : > { %3411 = vrcp.f32 %v3758_v6  ;;  %v3256_v24 = vld [vmem:[%s4114_s20 + $0x8] sm:$0xff]  ;;  %1091 = vmatpush.bf16.msra.mxu0 %v3254_v23  ;;  %v3255_v28 = vld [vmem:[%s4114_s20] sm:$0xff]  ;;  %s4952_s2 = scalar_lea.vmem %s4859_s6, %s4099_s12  ;;  %s3759_s21 = smov 104   ;;  %vm1188_vm9 = vcmask 1047556   ;;  %vm1912_vm10 = vcmask 64512   ;;  %vm2164_vm11 = vcmask 1043456  }
  0xba   : > { %v3258_v25 = vld [vmem:[%s4123_s3 + $0x8] sm:$0xff]  ;;  %1125 = vmatpush.bf16.msra.mxu1 %v3256_v24  ;;  %v3257_v30 = vld [vmem:[%s4123_s3] sm:$0xff]  ;;  %s4950_s3 = sld [smem:[#allocation34_spill]]  ;;  %s3760_s29 = smov 112   ;;  %vm2560_vm12 = vcmask 130048   ;;  %vm2563_vm13 = vcmask 195584  }
  0xbb   : > { %1159 = vmatpush.bf16.msra.mxu2 %v3258_v25  ;;  %v3401_v48 = vld [vmem:[%s4948_s5] ss:$0 sm:$0xff]  ;;  %s3761_s1 = smov 120   ;;  %s3765_s18 = smov 16  }
  0xbc   : > { %v3402_v53 = vld [vmem:[%s4949_s11] ss:$0 sm:$0xff]  ;;  %s3766_s4 = smov 8   ;;  %s4954_s26 = scalar_lea.vmem [#allocation9], %s4082_s17 }
  0xbd   : > { %v995_v2 = vld [vmem:[#allocation2] sm:$0xff]  ;;  %1092 = vmatpush.bf16.msra.mxu0 %v3253_v27  ;;  %s4955_s5 = smov %s4954_s26  ;;  %p3239_p8 = scmp.ne.s32.totalorder %s3973_s14, 1 }
  0xbe   : > { %v1000_v3 = vsel %vm999_vm1, %v995_v2, 0.0  ;;  %v996_v4 = vld [vmem:[#allocation2 + $0x8] sm:$0xff]  ;;  %1126 = vmatpush.bf16.msra.mxu1 %v3255_v28  ;;  %v3404_v59 = vld [vmem:[%s4952_s2] ss:$0 sm:$0xff]  ;;  %s4964_s8 = sld [smem:[#allocation47_spill]] (!%p3239_p8) }
  0xbf   : > { %1001 = vadd.xlane.f32.xlu0 %v1000_v3  ;;  %v1003_v5 = vsel %vm999_vm1, %v996_v4, 0.0  ;;  %v3412_v7 = vpop.eup %3411  ;;  %1160 = vmatpush.bf16.msra.mxu2 %v3257_v30 }
  0xc0   : > { %v1007_v8 = vmul.f32 32.0, %v3412_v7  ;;  %vm1011_vm2 = vweird.f32 %v3412_v7  ;;  %s4951_s25 = scalar_lea.vmem %s4950_s3, %s4099_s12  ;;  %s4963_s12 = sld [smem:[#allocation46_spill]] (!%p3239_p8) }
  0xc1   : > { %v3403_v58 = vld [vmem:[%s4951_s25] ss:$0 sm:$0xff] }
  0xc2   : > { %v1008_v9 = vsub.f32 1.0, %v1007_v8  ;;  %v3762_v8 = vmov 1983009808  }
  0xc4   : > { %v1009_v10 = vmul.f32 %v3412_v7, %v1008_v9  ;;  %v1193_v9 = vunpack.c.l.s4 %v3762_v8 }
  0xc6   : > { %v1010_v11 = vadd.f32 %v3412_v7, %v1009_v10 }
  0xc7   : > { %1004 = vadd.xlane.f32.xlu0 %v1003_v5 }
  0xc8   : > { %v4158_v12 = vsel %vm1011_vm2, %v3412_v7, %v1010_v11 }
 0x132   : > { %v1002_v13 = vpop.xlane.xlu0 %1001 }
 0x133   : > { %v1013_v14 = vmul.f32 %v4158_v12, %v1002_v13 }
 0x135   : > { %v1015_v15 = vsub.f32 %v995_v2, %v1013_v14  ;;  %v4215_v14 = vunpack.c.0.s8 %v1193_v9 }
 0x137   : > { %v1017_v16 = vmul.f32 %v1015_v15, %v1015_v15 }
 0x139   : > { %v1019_v17 = vsel %vm999_vm1, %v1017_v16, 0.0 }
 0x13a   : > { %1020 = vadd.xlane.f32.xlu1 %v1019_v17  ;;  %v1005_v18 = vpop.xlane.xlu0 %1004 }
 0x13b   : > { %v1014_v19 = vmul.f32 %v4158_v12, %v1005_v18 }
 0x13d   : > { %v1016_v20 = vsub.f32 %v996_v4, %v1014_v19 }
 0x13f   : > { %v1018_v21 = vmul.f32 %v1016_v20, %v1016_v20 }
 0x141   : > { %v1022_v22 = vsel %vm999_vm1, %v1018_v21, 0.0  ;;  %v3763_v21 = vmov 1934713408  }
 0x142   : > { %1023 = vadd.xlane.f32.xlu1 %v1022_v22  ;;  %v1217_v22 = vunpack.c.l.s4 %v3763_v21 }
 0x144   : > { %v4226_v30 = vunpack.c.0.s8 %v1217_v22 }
 0x1ad   : > { %v1021_v26 = vpop.xlane.xlu1 %1020 }
 0x1ae   : > { %v1025_v29 = vmul.f32 %v1021_v26, %v4158_v12 }
 0x1b0   : > { %v1027_v31 = vadd.f32 1e-06, %v1025_v29 }
 0x1b2   : > { %3413 = vrsqrt.f32 %v1027_v31  ;;  %vm1035_vm4 = vweird.f32 %v1027_v31 }
 0x1b5   : > { %v1024_v32 = vpop.xlane.xlu1 %1023 }
 0x1b6   : > { %v1026_v33 = vmul.f32 %v1024_v32, %v4158_v12 }
 0x1b8   : > { %v3414_v34 = vpop.eup %3413  ;;  %v1028_v35 = vadd.f32 1e-06, %v1026_v33 }
 0x1b9   : > { %v1030_v36 = vmul.f32 %v3414_v34, %v1027_v31  ;;  %vm1036_vm3 = vweird.f32 %v3414_v34 }
 0x1ba   : > { %3415 = vrsqrt.f32 %v1028_v35  ;;  %vm1037_vm5 = vmor %vm1035_vm4, %vm1036_vm3  ;;  %vm1045_vm7 = vweird.f32 %v1028_v35 }
 0x1bb   : > { %v1031_v37 = vmul.f32 %v3414_v34, %v1030_v36 }
 0x1bd   : > { %v1032_v38 = vmul.f32 0.5, %v1031_v37 }
 0x1bf   : > { %v1033_v39 = vsub.f32 1.5, %v1032_v38 }
 0x1c0   : > { %v3416_v40 = vpop.eup %3415 }
 0x1c1   : > { %v1034_v41 = vmul.f32 %v3414_v34, %v1033_v39  ;;  %v1040_v42 = vmul.f32 %v3416_v40, %v1028_v35  ;;  %vm1046_vm6 = vweird.f32 %v3416_v40 }
 0x1c2   : > { %vm1047_vm8 = vmor %vm1045_vm7, %vm1046_vm6 }
 0x1c3   : > { %v1041_v43 = vmul.f32 %v3416_v40, %v1040_v42  ;;  %v1038_v44 = vsel %vm1037_vm5, %v3414_v34, %v1034_v41  ;;  %vm2739_vm5 = vcmask 523264  }
 0x1c4   : > { %v1049_v47 = vmul.f32 %v1038_v44, %v1015_v15 }
 0x1c5   : > { %v1042_v45 = vmul.f32 0.5, %v1041_v43 }
 0x1c6   : > { %v1054_v52 = vmul.f32 %v3401_v48, %v1049_v47 }
 0x1c7   : > { %v1043_v46 = vsub.f32 1.5, %v1042_v45 }
 0x1c8   : > { %v1059_v55 = vadd.f32 %v3402_v53, %v1054_v52 }
 0x1c9   : > { %v1044_v49 = vmul.f32 %v3416_v40, %v1043_v46 }
 0x1cb   : > { %v1048_v50 = vsel %vm1047_vm8, %v3416_v40, %v1044_v49 }
 0x1cc   : > { %v1050_v51 = vmul.f32 %v1048_v50, %v1016_v20 }
 0x1ce   : > { %v1055_v54 = vmul.f32 %v3401_v48, %v1050_v51 }
 0x1d0   : > { %v1060_v56 = vadd.f32 %v3402_v53, %v1055_v54 }
 0x1d2   : > { %v1061_v57 = vpack.c.bf16 %v1060_v56, %v1059_v55 }
 0x1d4   : > { %3169 = vmatmul.msk.bf16.vlgmr.msra.gmra.mxu0 %vm999_vm1, %v1061_v57  ;;  %3178 = vmatmul.msk.bf16.vlgmr.msra.gmra.mxu1 %vm999_vm1, %v1061_v57 }
 0x1d5   : > { %3187 = vmatmul.msk.bf16.vlgmr.msra.gmra.mxu2 %vm999_vm1, %v1061_v57 }
 0x251   : > { %v1094_v60 = vpop.f32.mrf.mxu0  ;;  %v1128_v61 = vpop.f32.mrf.mxu1 }
 0x252   : > { %v4189_v62 = vadd.f32 %v3403_v58, %v1094_v60  ;;  %v1129_v63 = vadd.f32 %v3404_v59, %v1128_v61 }
 0x254   : > { %1430 = vrot.lane.b32.xlu0 %v1129_v63, %s3759_s21  ;;  %1175 = vrot.lane.b32.xlu1 %v4189_v62, %s3760_s29  ;;  %v3366_v0 = vpack.i.bf16 %v4189_v62, %v1129_v63  ;;  %v1438_v11 = vrot.slane %v1129_v63, 4  ;;  %v1190_v29 = vrot.slane %v4189_v62, 4 }
 0x256   : > { %3367 = vrot.lane.b32.xlu2 %v3366_v0, %s3761_s1 }
 0x259   : > { %v1096_v1 = vpop.f32.mrf.mxu0  ;;  %v1130_v2 = vpop.f32.mrf.mxu1 }
 0x25a   : > { %v4196_v3 = vadd.f32 %v3403_v58, %v1096_v1  ;;  %v4198_v4 = vadd.f32 %v3404_v59, %v1130_v2 }
 0x25c   : > { %1432 = vrot.lane.b32.xlu0 %v4198_v4, %s3759_s21  ;;  %1177 = vrot.lane.b32.xlu1 %v4196_v3, %s3760_s29  ;;  %v1246_v33 = vrot.slane %v4196_v3, 4  ;;  %v1494_v34 = vrot.slane %v4198_v4, 4 }
 0x25e   : > { %1424 = vrot.lane.b32.xlu2 %v1129_v63, %s3760_s29 }
 0x264   : > { %1183 = vrot.lane.b32.xlu0 %v4196_v3, %s3759_s21 }
 0x266   : > { %1181 = vrot.lane.b32.xlu2 %v4189_v62, %s3759_s21 }
 0x26e   : > { %1420 = vrot.lane.b32.xlu2 %v4198_v4, %s3761_s1 }
 0x276   : > { %1426 = vrot.lane.b32.xlu2 %v4198_v4, %s3760_s29 }
 0x27e   : > { %1171 = vrot.lane.b32.xlu2 %v4196_v3, %s3761_s1 }
 0x2b0   : > { %v3368_v5 = vpop.permute.xlu2 %3367 }
 0x2b1   : > { %v3370_v7 = vunpack.i.h.bf16 %v3368_v5  ;;  %v3369_v16 = vunpack.i.l.bf16 %v3368_v5 }
 0x2b3   : > { %v1202_v13 = vrot.slane %v3370_v7, 4  ;;  %v1450_v26 = vrot.slane %v3369_v16, 4 }
 0x2b8   : > { %v1425_v6 = vpop.permute.xlu2 %1424 }
 0x2b9   : > { %v1436_v10 = vrot.slane %v1425_v6, 4  ;;  %v1439_v18 = vsel %vm1188_vm9, %v1425_v6, %v1438_v11 }
 0x2ba   : > { %v1447_v25 = vperm.slane %v1439_v18, %v4215_v14 }
 0x2bb   : > { %v1437_v17 = vsel %vm1188_vm9, %v1436_v10, %v1129_v63 }
 0x2bc   : > { %v1443_v24 = vperm.slane %v1437_v17, %v4215_v14  ;;  %v1474_v40 = vrot.slane %v1447_v25, 4 }
 0x2be   : > { %v1462_v39 = vrot.slane %v1443_v24, 4 }
 0x2c0   : > { %v1182_v15 = vpop.permute.xlu2 %1181 }
 0x2c1   : > { %v1200_v19 = vrot.slane %v1182_v15, 4  ;;  %v1203_v20 = vsel %vm1188_vm9, %v1182_v15, %v1202_v13 }
 0x2c2   : > { %v1211_v28 = vperm.slane %v1203_v20, %v4215_v14 }
 0x2c3   : > { %v1201_v23 = vsel %vm1188_vm9, %v1200_v19, %v3370_v7 }
 0x2c4   : > { %v1207_v27 = vperm.slane %v1201_v23, %v4215_v14  ;;  %v1224_v45 = vrot.slane %v1211_v28, 4 }
 0x2c6   : > { %v1431_v31 = vpop.permute.xlu0 %1430  ;;  %v1176_v32 = vpop.permute.xlu1 %1175  ;;  %v1212_v44 = vrot.slane %v1207_v27, 4 }
 0x2c7   : > { %v1448_v35 = vrot.slane %v1431_v31, 4  ;;  %v1451_v36 = vsel %vm1188_vm9, %v1431_v31, %v1450_v26  ;;  %v1187_v37 = vrot.slane %v1176_v32, 4  ;;  %v1191_v38 = vsel %vm1188_vm9, %v1176_v32, %v1190_v29 }
 0x2c8   : > { %v1459_v41 = vperm.slane %v1451_v36, %v4215_v14  ;;  %v1199_v42 = vperm.slane %v1191_v38, %v4215_v14  ;;  %v1421_v43 = vpop.permute.xlu2 %1420 }
 0x2c9   : > { %v1449_v46 = vsel %vm1188_vm9, %v1448_v35, %v3369_v16  ;;  %v1189_v47 = vsel %vm1188_vm9, %v1187_v37, %v4189_v62  ;;  %v1506_v55 = vrot.slane %v1421_v43, 4 }
 0x2ca   : > { %v1455_v48 = vperm.slane %v1449_v46, %v4215_v14  ;;  %v1472_v49 = vrot.slane %v1459_v41, 4  ;;  %v1475_v50 = vsel %vm1188_vm9, %v1459_v41, %v1474_v40  ;;  %v1195_v51 = vperm.slane %v1189_v47, %v4215_v14 }
 0x2cb   : > { %v1483_v52 = vperm.slane %v1475_v50, %v4226_v30  ;;  %v1225_v53 = vsel %vm1188_vm9, %v1224_v45, %v1199_v42  ;;  %v1226_v54 = vrot.slane %v1199_v42, 4 }
 0x2cc   : > { %v1460_v56 = vrot.slane %v1455_v48, 4  ;;  %v1463_v57 = vsel %vm1188_vm9, %v1455_v48, %v1462_v39  ;;  %v1473_v58 = vsel %vm1188_vm9, %v1472_v49, %v1447_v25  ;;  %v1213_v59 = vsel %vm1188_vm9, %v1212_v44, %v1195_v51 }
 0x2cd   : > { %v1471_v60 = vperm.slane %v1463_v57, %v4226_v30  ;;  %v1479_v61 = vperm.slane %v1473_v58, %v4226_v30  ;;  %v1490_v62 = vrot.slane %v1483_v52, 4  ;;  %v1214_v63 = vrot.slane %v1195_v51, 4 }
 0x2ce   : > { %v1461_v0 = vsel %vm1188_vm9, %v1460_v56, %v1443_v24  ;;  %v1219_v1 = vperm.slane %v1213_v59, %v4226_v30  ;;  %v1227_v2 = vsel %vm1188_vm9, %v1211_v28, %v1226_v54  ;;  %v1231_v5 = vperm.slane %v1225_v53, %v4226_v30  ;;  %v1433_v6 = vpop.permute.xlu0 %1432  ;;  %v1178_v22 = vpop.permute.xlu1 %1177 }
 0x2cf   : > { %v1467_v7 = vperm.slane %v1461_v0, %v4226_v30  ;;  %v1486_v8 = vrot.slane %v1471_v60, 4  ;;  %v1488_v9 = vrot.slane %v1479_v61, 4  ;;  %v1491_v10 = vsel %vm1188_vm9, 0.0, %v1490_v62 }
 0x2d0   : > { %v1559_v11 = vsel %vm1188_vm9, %v1490_v62, %v1479_v61  ;;  %v1564_v13 = vrot.slane %v1491_v10, 4  ;;  %v1215_v15 = vsel %vm1188_vm9, %v1207_v27, %v1214_v63  ;;  %v1235_v16 = vperm.slane %v1227_v2, %v4226_v30  ;;  %v1427_v17 = vpop.permute.xlu2 %1426 }
 0x2d1   : > { %v1484_v18 = vrot.slane %v1467_v7, 4  ;;  %v1487_v19 = vsel %vm1188_vm9, 0.0, %v1486_v8  ;;  %v1489_v20 = vsel %vm1188_vm9, 0.0, %v1488_v9  ;;  %v4259_v21 = vperm.slane %v1559_v11, %v4215_v14 }
 0x2d2   : > { %v1553_v23 = vrot.slane %v1487_v19, 4  ;;  %v4262_v24 = vsel %vm1188_vm9, %v1564_v13, %v1489_v20  ;;  %v1223_v25 = vperm.slane %v1215_v15, %v4226_v30  ;;  %v1236_v26 = vrot.slane %v1219_v1, 4 }
 0x2d3   : > { %v1240_v27 = vrot.slane %v1231_v5, 4  ;;  %v1242_v28 = vrot.slane %v1235_v16, 4  ;;  %v1504_v29 = vrot.slane %v1433_v6, 4  ;;  %v1507_v31 = vsel %vm1188_vm9, %v1433_v6, %v1506_v55 }
 0x2d4   : > { %v4267_v32 = vsel %vm1188_vm9, 0.0, %v1236_v26  ;;  %v1238_v35 = vrot.slane %v1223_v25, 4  ;;  %v1515_v36 = vperm.slane %v1507_v31, %v4215_v14  ;;  %v1244_v37 = vrot.slane %v1178_v22, 4 }
 0x2d5   : > { %v1241_v38 = vsel %vm1188_vm9, 0.0, %v1240_v27  ;;  %v1243_v39 = vsel %vm1188_vm9, 0.0, %v1242_v28  ;;  %v1311_v40 = vsel %vm1188_vm9, %v1242_v28, %v1231_v5  ;;  %v1505_v41 = vsel %vm1188_vm9, %v1504_v29, %v1421_v43 }
 0x2d6   : > { %v4275_v42 = vsel %vm1188_vm9, 0.0, %v1238_v35  ;;  %v1300_v44 = vsel %vm1188_vm9, %v1238_v35, %v1219_v1  ;;  %v4279_v45 = vperm.slane %v1311_v40, %v4215_v14  ;;  %v1316_v46 = vrot.slane %v1243_v39, 4  ;;  %v1184_v51 = vpop.permute.xlu0 %1183 }
 0x2d7   : > { %v4282_v47 = vperm.slane %v1300_v44, %v4215_v14  ;;  %v1305_v48 = vrot.slane %v4275_v42, 4  ;;  %v1511_v49 = vperm.slane %v1505_v41, %v4215_v14  ;;  %v1528_v50 = vrot.slane %v1515_v36, 4 }
 0x2d8   : > { %v1317_v43 = vsel %vm1188_vm9, %v1316_v46, %v1241_v38  ;;  %v1336_v52 = vrot.slane %v4279_v45, 4  ;;  %v1245_v53 = vsel %vm1188_vm9, %v1244_v37, %v4196_v3  ;;  %v1247_v54 = vsel %vm1188_vm9, %v1178_v22, %v1246_v33  ;;  %v1172_v55 = vpop.permute.xlu2 %1171 }
 0x2d9   : > { %v4294_v56 = vperm.slane %v1317_v43, %v4215_v14  ;;  %v1516_v57 = vrot.slane %v1511_v49, 4  ;;  %v1251_v58 = vperm.slane %v1245_v53, %v4215_v14  ;;  %v1255_v59 = vperm.slane %v1247_v54, %v4215_v14 }
 0x2da   : > { %v1492_v60 = vrot.slane %v1427_v17, 4  ;;  %v1495_v61 = vsel %vm1188_vm9, %v1427_v17, %v1494_v34  ;;  %v1256_v62 = vrot.slane %v1184_v51, 4  ;;  %v1258_v63 = vrot.slane %v1172_v55, 4 }
 0x2db   : > { %v1270_v0 = vrot.slane %v1251_v58, 4  ;;  %v1282_v3 = vrot.slane %v1255_v59, 4  ;;  %v1503_v33 = vperm.slane %v1495_v61, %v4215_v14  ;;  %v1485_v1 = vsel %vm1188_vm9, 0.0, %v1484_v18 }
 0x2dc   : > { %v1493_v2 = vsel %vm1188_vm9, %v1492_v60, %v4198_v4  ;;  %v1257_v5 = vsel %vm1188_vm9, %v1256_v62, %v1172_v55  ;;  %v1259_v6 = vsel %vm1188_vm9, %v1184_v51, %v1258_v63  ;;  %v1548_v9 = vsel %vm1188_vm9, %v1486_v8, %v1467_v7 }
 0x2dd   : > { %v1499_v10 = vperm.slane %v1493_v2, %v4215_v14  ;;  %v1529_v34 = vsel %vm1188_vm9, %v1528_v50, %v1503_v33  ;;  %v1530_v11 = vrot.slane %v1503_v33, 4  ;;  %v1263_v13 = vperm.slane %v1257_v5, %v4215_v14 }
 0x2de   : > { %v1535_v15 = vperm.slane %v1529_v34, %v4226_v30  ;;  %v1267_v16 = vperm.slane %v1259_v6, %v4215_v14  ;;  %v4314_v17 = vperm.slane %v1548_v9, %v4215_v14  ;;  %v1554_v4 = vsel %vm1188_vm9, %v1553_v23, %v1485_v1 }
 0x2df   : > { %v1517_v18 = vsel %vm1188_vm9, %v1516_v57, %v1499_v10  ;;  %v1518_v19 = vrot.slane %v1499_v10, 4  ;;  %v1531_v7 = vsel %vm1188_vm9, %v1515_v36, %v1530_v11  ;;  %v1268_v8 = vrot.slane %v1263_v13, 4 }
 0x2e0   : > { %v1523_v20 = vperm.slane %v1517_v18, %v4226_v30  ;;  %v1539_v22 = vperm.slane %v1531_v7, %v4226_v30  ;;  %v1544_v25 = vrot.slane %v1535_v15, 4  ;;  %v1271_v26 = vsel %vm1188_vm9, %v1263_v13, %v1270_v0 }
 0x2e1   : > { %v1519_v27 = vsel %vm1188_vm9, %v1511_v49, %v1518_v19  ;;  %v1269_v28 = vsel %vm1188_vm9, %v1268_v8, %v1251_v58  ;;  %v1279_v29 = vperm.slane %v1271_v26, %v4226_v30  ;;  %v1280_v23 = vrot.slane %v1267_v16, 4 }
 0x2e2   : > { %v1527_v31 = vperm.slane %v1519_v27, %v4226_v30  ;;  %v1540_v35 = vrot.slane %v1523_v20, 4  ;;  %v1545_v36 = vsel %vm1188_vm9, 0.0, %v1544_v25  ;;  %v1546_v37 = vrot.slane %v1539_v22, 4 }
 0x2e3   : > { %v1275_v38 = vperm.slane %v1269_v28, %v4226_v30  ;;  %v1281_v39 = vsel %vm1188_vm9, %v1280_v23, %v1255_v59  ;;  %v1283_v40 = vsel %vm1188_vm9, %v1267_v16, %v1282_v3  ;;  %v1294_v41 = vrot.slane %v1279_v29, 4 }
 0x2e4   : > { %v4331_v44 = vsel %vm1188_vm9, 0.0, %v1540_v35  ;;  %v1542_v46 = vrot.slane %v1527_v31, 4  ;;  %v1547_v49 = vsel %vm1188_vm9, 0.0, %v1546_v37  ;;  %v1613_v50 = vsel %vm1188_vm9, %v1546_v37, %v1535_v15 }
 0x2e5   : > { %v4336_v51 = vperm.slane %v1613_v50, %v4215_v14  ;;  %v1618_v43 = vrot.slane %v1547_v49, 4  ;;  %v1287_v53 = vperm.slane %v1281_v39, %v4226_v30  ;;  %v1291_v54 = vperm.slane %v1283_v40, %v4226_v30 }
 0x2e6   : > { %v4341_v55 = vsel %vm1188_vm9, 0.0, %v1542_v46  ;;  %v4344_v57 = vsel %vm1188_vm9, %v1542_v46, %v1523_v20  ;;  %v1292_v58 = vrot.slane %v1275_v38, 4  ;;  %v1295_v59 = vsel %vm1188_vm9, 0.0, %v1294_v41 }
 0x2e7   : > { %v1607_v60 = vrot.slane %v4341_v55, 4  ;;  %v1619_v61 = vsel %vm1188_vm9, %v1618_v43, %v1545_v36  ;;  %v1638_v62 = vrot.slane %v4336_v51, 4  ;;  %v1296_v63 = vrot.slane %v1287_v53, 4 }
 0x2e8   : > { %v4351_v0 = vperm.slane %v1619_v61, %v4215_v14  ;;  %v1293_v3 = vsel %vm1188_vm9, 0.0, %v1292_v58  ;;  %v1298_v33 = vrot.slane %v1291_v54, 4  ;;  %v1354_v1 = vsel %vm1188_vm9, %v1294_v41, %v1275_v38 }
 0x2e9   : > { %v1297_v2 = vsel %vm1188_vm9, 0.0, %v1296_v63  ;;  %v4357_v5 = vperm.slane %v1354_v1, %v4215_v14  ;;  %v1359_v6 = vrot.slane %v1295_v59, 4  ;;  %v1558_v9 = vperm.slane %v1554_v4, %v4215_v14 }
 0x2ea   : > { %v1299_v10 = vsel %vm1188_vm9, 0.0, %v1298_v33  ;;  %v1365_v34 = vsel %vm1188_vm9, %v1298_v33, %v1287_v53  ;;  %v1569_v11 = vperm.slane %v4262_v24, %v4215_v14  ;;  %v1572_v13 = vrot.slane %v4314_v17, 4 }
 0x2eb   : > { %v1360_v15 = vsel %vm1188_vm9, %v1359_v6, %v1293_v3  ;;  %v4367_v16 = vperm.slane %v1365_v34, %v4215_v14  ;;  %v1370_v18 = vrot.slane %v1299_v10, 4  ;;  %v1378_v19 = vrot.slane %v4357_v5, 4 }
 0x2ec   : > { %v4371_v7 = vperm.slane %v1360_v15, %v4215_v14  ;;  %v1573_v4 = vsel %vm1188_vm9, %v1558_v9, %v1572_v13  ;;  %v1584_v8 = vrot.slane %v4259_v21, 4  ;;  %v1570_v25 = vrot.slane %v1558_v9, 4 }
 0x2ed   : > { %v1371_v24 = vsel %vm1188_vm9, %v1370_v18, %v1297_v2  ;;  %v1390_v20 = vrot.slane %v4367_v16, 4  ;;  %v1581_v22 = vperm.slane %v1573_v4, %v4226_v30  ;;  %v1582_v28 = vrot.slane %v1569_v11, 4 }
 0x2ee   : > { %v4379_v26 = vperm.slane %v1371_v24, %v4215_v14  ;;  %v1585_v27 = vsel %vm1188_vm9, %v1569_v11, %v1584_v8  ;;  %v1306_v29 = vsel %vm1188_vm9, %v1305_v48, %v4267_v32  ;;  %v1571_v31 = vsel %vm1188_vm9, %v1570_v25, %v4314_v17 }
 0x2ef   : > { %v1593_v23 = vperm.slane %v1585_v27, %v4226_v30  ;;  %v1600_v35 = vrot.slane %v1581_v22, 4  ;;  %v1310_v36 = vperm.slane %v1306_v29, %v4215_v14  ;;  %v1577_v37 = vperm.slane %v1571_v31, %v4226_v30 }
 0x2f0   : > { %v1583_v38 = vsel %vm1188_vm9, %v1582_v28, %v4259_v21  ;;  %v1324_v39 = vrot.slane %v4282_v47, 4  ;;  %v1337_v32 = vsel %vm1188_vm9, %v4294_v56, %v1336_v52  ;;  %v1334_v10 = vrot.slane %v4294_v56, 4 }
 0x2f1   : > { %v1598_v42 = vrot.slane %v1593_v23, 4  ;;  %v1589_v48 = vperm.slane %v1583_v38, %v4226_v30  ;;  %v1601_v17 = vsel %vm1188_vm9, %v1593_v23, %v1600_v35  ;;  %v1345_v40 = vperm.slane %v1337_v32, %v4226_v30 }
 0x2f2   : > { %v1659_v41 = vpack.c.bf16 %v1601_v17, %v1601_v17  ;;  %v1596_v46 = vrot.slane %v1577_v37, 4  ;;  %v1325_v49 = vsel %vm1188_vm9, %v1310_v36, %v1324_v39  ;;  %v1322_v50 = vrot.slane %v1310_v36, 4 }
 0x2f3   : > { %v1599_v21 = vsel %vm1188_vm9, %v1598_v42, %v1581_v22  ;;  %v1594_v43 = vrot.slane %v1589_v48, 4  ;;  %v1333_v53 = vperm.slane %v1325_v49, %v4226_v30  ;;  %v1350_v54 = vrot.slane %v1345_v40, 4 }
 0x2f4   : > { %v1658_v58 = vpack.c.bf16 %v1599_v21, %v1599_v21  ;;  %v1974_v52 = vsel %vm1912_vm10, %v1659_v41, 0  ;;  %v1597_v59 = vsel %vm1188_vm9, %v1589_v48, %v1596_v46  ;;  %v1323_v61 = vsel %vm1188_vm9, %v1322_v50, %v4282_v47 }
 0x2f5   : > { %v1595_v63 = vsel %vm1188_vm9, %v1594_v43, %v1577_v37  ;;  %1983 = vmatpush.bf16.xpose.msrb.mxu2 %v1974_v52  ;;  %v1657_v3 = vpack.c.bf16 %v1597_v59, %v1597_v59  ;;  %v1351_v33 = vsel %vm1188_vm9, %v1350_v54, %v1333_v53  ;;  %v1329_v1 = vperm.slane %v1323_v61, %v4226_v30 }
 0x2f6   : > { %v1955_v2 = vsel %vm1912_vm10, %v1658_v58, 0  ;;  %v1656_v6 = vpack.c.bf16 %v1595_v63, %v1595_v63  ;;  %v1410_v9 = vpack.c.bf16 %v1351_v33, %v1351_v33  ;;  %v1352_v13 = vrot.slane %v1333_v53, 4 }
 0x2f7   : > { %1964 = vmatpush.bf16.xpose.msrb.mxu1 %v1955_v2  ;;  %v1936_v34 = vsel %vm1912_vm10, %v1657_v3, 0  ;;  %v1348_v11 = vrot.slane %v1329_v1, 4  ;;  %v1606_v47 = vperm.slane %v4344_v57, %v4215_v14  ;;  %v1335_v18 = vsel %vm1188_vm9, %v1334_v10, %v4279_v45 }
 0x2f8   : > { %v1917_v15 = vsel %vm1912_vm10, %v1656_v6, 0  ;;  %1945 = vmatpush.bf16.xpose.msrb.mxu0 %v1936_v34  ;;  %v1608_v4 = vsel %vm1188_vm9, %v1607_v60, %v4331_v44  ;;  %v1639_v56 = vsel %vm1188_vm9, %v4351_v0, %v1638_v62  ;;  %v1341_v8 = vperm.slane %v1335_v18, %v4226_v30 }
 0x2f9   : > { %1926 = vmatpush.bf16.xpose.msra.mxu3 %v1917_v15  ;;  %v1353_v57 = vsel %vm1188_vm9, %v1345_v40, %v1352_v13  ;;  %v1612_v24 = vperm.slane %v1608_v4, %v4215_v14  ;;  %v1626_v22 = vrot.slane %v1606_v47, 4  ;;  %v1647_v45 = vperm.slane %v1639_v56, %v4226_v30  ;;  %v1162_v15 = vpop.f32.mrf.mxu2 }
 0x2fa   : > { %v1411_v25 = vpack.c.bf16 %v1353_v57, %v1353_v57  ;;  %v1636_v55 = vrot.slane %v4351_v0, 4  ;;  %v1379_v44 = vsel %vm1188_vm9, %v4371_v7, %v1378_v19  ;;  %v1346_v60 = vrot.slane %v1341_v8, 4 }
 0x2fb   : > { %v1349_v62 = vsel %vm1188_vm9, %v1341_v8, %v1348_v11  ;;  %v1627_v27 = vsel %vm1188_vm9, %v1612_v24, %v1626_v22  ;;  %v1624_v28 = vrot.slane %v1612_v24, 4  ;;  %v1652_v31 = vrot.slane %v1647_v45, 4 }
 0x2fc   : > { %3191 = vmatmul.msk.bf16.vlgmr.msrb.gmra.mxu2 %vm1912_vm10, %v1411_v25  ;;  %v1409_v29 = vpack.c.bf16 %v1349_v62, %v1349_v62  ;;  %v1635_v23 = vperm.slane %v1627_v27, %v4226_v30  ;;  %v1637_v0 = vsel %vm1188_vm9, %v1636_v55, %v4336_v51  ;;  %v1347_v35 = vsel %vm1188_vm9, %v1346_v60, %v1329_v1 }
 0x2fd   : > { %v1625_v36 = vsel %vm1188_vm9, %v1624_v28, %v1606_v47  ;;  %v1643_v19 = vperm.slane %v1637_v0, %v4226_v30  ;;  %v1387_v37 = vperm.slane %v1379_v44, %v4226_v30  ;;  %v1408_v38 = vpack.c.bf16 %v1347_v35, %v1347_v35 }
 0x2fe   : > { %3190 = vmatmul.msk.bf16.vlgmr.msrb.gmra.mxu1 %vm1912_vm10, %v1410_v9  ;;  %v1653_v39 = vsel %vm1188_vm9, %v1652_v31, %v1635_v23  ;;  %v1631_v32 = vperm.slane %v1625_v36, %v4226_v30  ;;  %v1654_v42 = vrot.slane %v1635_v23, 4  ;;  %v1391_v17 = vsel %vm1188_vm9, %v4379_v26, %v1390_v20 }
 0x2ff   : > { %3189 = vmatmul.msk.bf16.vlgmr.msrb.gmra.mxu0 %vm1912_vm10, %v1409_v29  ;;  %v1662_v48 = vpack.c.bf16 %v1653_v39, %v1653_v39  ;;  %v1648_v51 = vrot.slane %v1643_v19, 4  ;;  %v1376_v40 = vrot.slane %v4371_v7, 4  ;;  %v1399_v49 = vperm.slane %v1391_v17, %v4226_v30 }
 0x300   : > { %3188 = vmatmul.msk.bf16.vlgmr.msra.gmra.mxu3 %vm1912_vm10, %v1408_v38  ;;  %v1650_v41 = vrot.slane %v1631_v32, 4  ;;  %v1655_v46 = vsel %vm1188_vm9, %v1647_v45, %v1654_v42  ;;  %v1388_v50 = vrot.slane %v4379_v26, 4  ;;  %v1406_v61 = vrot.slane %v1387_v37, 4 }
 0x301   : > { %v2031_v21 = vsel %vm1912_vm10, %v1662_v48, 0  ;;  %v1649_v43 = vsel %vm1188_vm9, %v1648_v51, %v1631_v32  ;;  %v1663_v53 = vpack.c.bf16 %v1655_v46, %v1655_v46  ;;  %v1377_v54 = vsel %vm1188_vm9, %v1376_v40, %v4357_v5  ;;  %v1164_v18 = vpop.f32.mrf.mxu2  ;;  %v3405_v32 = vld [vmem:[%s967_s30] ss:$0 sm:$0xff]  ;;  %s3764_s30 = smov 24  }
 0x302   : > { %2040 = vmatpush.bf16.xpose.msra.mxu1 %v2031_v21  ;;  %v1660_v20 = vpack.c.bf16 %v1649_v43, %v1649_v43  ;;  %v1651_v7 = vsel %vm1188_vm9, %v1643_v19, %v1650_v41  ;;  %v1383_v58 = vperm.slane %v1377_v54, %v4226_v30  ;;  %v1389_v26 = vsel %vm1188_vm9, %v1388_v50, %v4367_v16 }
 0x303   : > { %v2050_v52 = vsel %vm1912_vm10, %v1663_v53, 0  ;;  %v1661_v59 = vpack.c.bf16 %v1651_v7, %v1651_v7  ;;  %v1395_v3 = vperm.slane %v1389_v26, %v4226_v30  ;;  %v1404_v33 = vrot.slane %v1399_v49, 4 }
 0x304   : > { %v1993_v63 = vsel %vm1912_vm10, %v1660_v20, 0  ;;  %2059 = vmatpush.bf16.xpose.msra.mxu2 %v2050_v52  ;;  %v1402_v1 = vrot.slane %v1383_v58, 4  ;;  %v1407_v6 = vsel %vm1188_vm9, %v1399_v49, %v1406_v61  ;;  %v4495_v42 = vadd.f32 %v3405_v32, %v1164_v18 }
 0x305   : > { %2002 = vmatpush.bf16.xpose.msrb.mxu3 %v1993_v63  ;;  %v2012_v5 = vsel %vm1912_vm10, %v1661_v59, 0  ;;  %v1400_v2 = vrot.slane %v1395_v3, 4  ;;  %v1405_v9 = vsel %vm1188_vm9, %v1404_v33, %v1387_v37  ;;  %v1415_v10 = vpack.c.bf16 %v1407_v6, %v1407_v6 }
 0x306   : > { %2021 = vmatpush.bf16.xpose.msra.mxu0 %v2012_v5  ;;  %v1403_v16 = vsel %vm1188_vm9, %v1395_v3, %v1402_v1  ;;  %v1414_v11 = vpack.c.bf16 %v1405_v9, %v1405_v9  ;;  %v4497_v48 = vadd.f32 %v3405_v32, %v1162_v15 }
 0x307   : > { %v1401_v34 = vsel %vm1188_vm9, %v1400_v2, %v1383_v58  ;;  %v1413_v13 = vpack.c.bf16 %v1403_v16, %v1403_v16 }
 0x308   : > { %v1412_v47 = vpack.c.bf16 %v1401_v34, %v1401_v34  ;;  %v3371_v51 = vpack.i.bf16 %v4495_v42, %v4497_v48 }
 0x30c   : > { %3195 = vmatmul.msk.bf16.vlgmr.msra.gmra.mxu2 %vm1912_vm10, %v1415_v10 }
 0x30e   : > { %3194 = vmatmul.msk.bf16.vlgmr.msra.gmra.mxu1 %vm1912_vm10, %v1414_v11 }
 0x30f   : > { %3193 = vmatmul.msk.bf16.vlgmr.msra.gmra.mxu0 %vm1912_vm10, %v1413_v13 }
 0x310   : > { %3192 = vmatmul.msk.bf16.vlgmr.msrb.gmra.mxu3 %vm1912_vm10, %v1412_v47 }
 0x37b   : > { %v1966_v4 = vpop.f32.mrf.mxu1 }
 0x37c   : > { %v2071_v56 = vsel %vm1912_vm10, %v1966_v4, -inf  ;;  %v1947_v8 = vpop.f32.mrf.mxu0 }
 0x37d   : > { %2072 = vmax.xlane.f32.xlu0 %v2071_v56  ;;  %v2068_v57 = vsel %vm1912_vm10, %v1947_v8, -inf }
 0x37e   : > { %2069 = vmax.xlane.f32.xlu2 %v2068_v57 }
 0x37f   : > { %v1985_v24 = vpop.f32.mrf.mxu2 }
 0x380   : > { %v2074_v22 = vsel %vm1912_vm10, %v1985_v24, -inf }
 0x381   : > { %2075 = vmax.xlane.f32.xlu1 %v2074_v22 }
 0x383   : > { %v1928_v25 = vpop.f32.mrf.mxu3  ;;  %v1968_v45 = vpop.f32.mrf.mxu1 }
 0x384   : > { %v1949_v55 = vpop.f32.mrf.mxu0  ;;  %v2065_v44 = vsel %vm1912_vm10, %v1928_v25, -inf }
 0x386   : > { %2066 = vmax.xlane.f32.xlu2 %v2065_v44  ;;  %v1742_v44 = vrot.slane %v4495_v42, 4 }
 0x387   : > { %v1987_v60 = vpop.f32.mrf.mxu2 }
 0x38b   : > { %v1930_v62 = vpop.f32.mrf.mxu3  ;;  %v2042_v27 = vpop.f32.mrf.mxu1 }
 0x38c   : > { %v4483_v28 = vpop.f32.mrf.mxu0  ;;  %v2083_v23 = vsel %vm1912_vm10, %v2042_v27, -inf }
 0x38d   : > { %v2080_v29 = vsel %vm1912_vm10, %v4483_v28, -inf }
 0x38e   : > { %2081 = vmax.xlane.f32.xlu1 %v2080_v29  ;;  %2084 = vmax.xlane.f32.xlu2 %v2083_v23 }
 0x38f   : > { %v2061_v31 = vpop.f32.mrf.mxu2 }
 0x390   : > { %v2086_v0 = vsel %vm1912_vm10, %v2061_v31, -inf }
 0x391   : > { %2087 = vmax.xlane.f32.xlu0 %v2086_v0 }
 0x393   : > { %v2004_v35 = vpop.f32.mrf.mxu3  ;;  %v2044_v36 = vpop.f32.mrf.mxu1 }
 0x394   : > { %v2025_v19 = vpop.f32.mrf.mxu0  ;;  %v2077_v37 = vsel %vm1912_vm10, %v2004_v35, -inf }
 0x396   : > { %2078 = vmax.xlane.f32.xlu1 %v2077_v37 }
 0x397   : > { %v2063_v38 = vpop.f32.mrf.mxu2 }
 0x39b   : > { %v2006_v39 = vpop.f32.mrf.mxu3 }
 0x3a5   : > { %3372 = vrot.lane.b32.xlu0 %v3371_v51, %s3761_s1 }
 0x3a6   : > { %3377 = vrot.lane.b32.xlu2 %v3371_v51, %s3760_s29 }
 0x3af   : > { %3382 = vrot.lane.b32.xlu1 %v3371_v51, %s3759_s21 }
 0x3f0   : > { %v2073_v17 = vpop.xlane.xlu0 %2072 }
 0x3f1   : > { %v2091_v40 = vsub.f32 %v1966_v4, %v2073_v17  ;;  %v2070_v41 = vpop.xlane.xlu2 %2069 }
 0x3f2   : > { %v2090_v20 = vsub.f32 %v1947_v8, %v2070_v41 }
 0x3f3   : > { %v2101_v46 = vmul.f32 1.442695, %v2091_v40 }
 0x3f4   : > { %v2076_v49 = vpop.xlane.xlu1 %2075  ;;  %v2099_v59 = vmul.f32 1.442695, %v2090_v20 }
 0x3f5   : > { %3417 = vpow2.f32 %v2101_v46  ;;  %v2092_v50 = vsub.f32 %v1985_v24, %v2076_v49 }
 0x3f7   : > { %v2103_v21 = vmul.f32 1.442695, %v2092_v50 }
 0x3f9   : > { %3419 = vpow2.f32 %v2103_v21  ;;  %v2067_v43 = vpop.xlane.xlu2 %2066 }
 0x3fa   : > { %v2089_v53 = vsub.f32 %v1928_v25, %v2067_v43 }
 0x3fb   : > { %v4504_v54 = vpop.eup %3417 }
 0x3fc   : > { %v2097_v7 = vmul.f32 1.442695, %v2089_v53  ;;  %v2119_v58 = vsel %vm1912_vm10, %v4504_v54, 0.0 }
 0x3fd   : > { %2120 = vadd.xlane.f32.xlu1 %v2119_v58 }
 0x3fe   : > { %3421 = vpow2.f32 %v2097_v7 }
 0x3ff   : > { %v4508_v52 = vpop.eup %3419  ;;  %3423 = vpow2.f32 %v2099_v59 }
 0x400   : > { %v2122_v26 = vsel %vm1912_vm10, %v4508_v52, 0.0 }
 0x401   : > { %v2082_v61 = vpop.xlane.xlu1 %2081  ;;  %v2085_v63 = vpop.xlane.xlu2 %2084  ;;  %2123 = vadd.xlane.f32.xlu2 %v2122_v26 }
 0x402   : > { %v2095_v3 = vsub.f32 %v2042_v27, %v2085_v63  ;;  %v2094_v15 = vsub.f32 %v4483_v28, %v2082_v61  ;;  %v1686_v27 = vrot.slane %v4497_v48, 4 }
 0x404   : > { %v4512_v5 = vpop.eup %3421  ;;  %v2109_v33 = vmul.f32 1.442695, %v2095_v3  ;;  %v2088_v1 = vpop.xlane.xlu0 %2087  ;;  %v2107_v56 = vmul.f32 1.442695, %v2094_v15 }
 0x405   : > { %v2096_v2 = vsub.f32 %v2061_v31, %v2088_v1  ;;  %v2113_v6 = vsel %vm1912_vm10, %v4512_v5, 0.0  ;;  %v4516_v16 = vpop.eup %3423 }
 0x406   : > { %2114 = vadd.xlane.f32.xlu0 %v2113_v6  ;;  %3425 = vpow2.f32 %v2109_v33  ;;  %v2116_v47 = vsel %vm1912_vm10, %v4516_v16, 0.0 }
 0x407   : > { %v2111_v9 = vmul.f32 1.442695, %v2096_v2 }
 0x409   : > { %v2079_v10 = vpop.xlane.xlu1 %2078  ;;  %3427 = vpow2.f32 %v2111_v9  ;;  %v3378_v8 = vpop.permute.xlu2 %3377 }
 0x40a   : > { %v2093_v34 = vsub.f32 %v2004_v35, %v2079_v10  ;;  %v3380_v22 = vunpack.i.h.bf16 %v3378_v8  ;;  %v3379_v45 = vunpack.i.l.bf16 %v3378_v8 }
 0x40c   : > { %v4518_v11 = vpop.eup %3425  ;;  %v2105_v13 = vmul.f32 1.442695, %v2093_v34  ;;  %v1740_v55 = vrot.slane %v3380_v22, 4  ;;  %v1684_v28 = vrot.slane %v3379_v45, 4  ;;  %v1743_v29 = vsel %vm1188_vm9, %v3380_v22, %v1742_v44 }
 0x40d   : > { %v2131_v18 = vsel %vm1912_vm10, %v4518_v11, 0.0  ;;  %v1687_v31 = vsel %vm1188_vm9, %v3379_v45, %v1686_v27  ;;  %v1751_v38 = vperm.slane %v1743_v29, %v4215_v14 }
 0x40e   : > { %2117 = vadd.xlane.f32.xlu0 %v2116_v47  ;;  %2132 = vadd.xlane.f32.xlu1 %v2131_v18  ;;  %3429 = vpow2.f32 %v2105_v13  ;;  %v1741_v23 = vsel %vm1188_vm9, %v1740_v55, %v4495_v42  ;;  %v1685_v19 = vsel %vm1188_vm9, %v1684_v28, %v4497_v48  ;;  %v1695_v39 = vperm.slane %v1687_v31, %v4215_v14 }
 0x40f   : > { %v4525_v4 = vpop.eup %3427  ;;  %3431 = vpow2.f32 %v2107_v56  ;;  %v1747_v37 = vperm.slane %v1741_v23, %v4215_v14  ;;  %v1691_v41 = vperm.slane %v1685_v19, %v4215_v14  ;;  %v1778_v21 = vrot.slane %v1751_v38, 4 }
 0x410   : > { %v2134_v57 = vsel %vm1912_vm10, %v4525_v4, 0.0  ;;  %v1722_v7 = vrot.slane %v1695_v39, 4 }
 0x411   : > { %v1766_v20 = vrot.slane %v1747_v37, 4  ;;  %v1710_v33 = vrot.slane %v1691_v41, 4 }
 0x414   : > { %v4529_v24 = vpop.eup %3429 }
 0x415   : > { %v2125_v25 = vsel %vm1912_vm10, %v4529_v24, 0.0  ;;  %v4534_v62 = vpop.eup %3431 }
 0x416   : > { %2135 = vadd.xlane.f32.xlu0 %v2134_v57  ;;  %2126 = vadd.xlane.f32.xlu2 %v2125_v25  ;;  %v2128_v36 = vsel %vm1912_vm10, %v4534_v62, 0.0 }
 0x417   : > { %v3373_v60 = vpop.permute.xlu0 %3372 }
 0x418   : > { %v3375_v0 = vunpack.i.h.bf16 %v3373_v60  ;;  %v3374_v35 = vunpack.i.l.bf16 %v3373_v60 }
 0x41a   : > { %v1754_v51 = vrot.slane %v3375_v0, 4  ;;  %v1698_v42 = vrot.slane %v3374_v35, 4 }
 0x41e   : > { %2129 = vadd.xlane.f32.xlu2 %v2128_v36 }
 0x421   : > { %v3383_v32 = vpop.permute.xlu1 %3382 }
 0x422   : > { %v3385_v17 = vunpack.i.h.bf16 %v3383_v32  ;;  %v3384_v40 = vunpack.i.l.bf16 %v3383_v32 }
 0x424   : > { %v1752_v46 = vrot.slane %v3385_v17, 4  ;;  %v1755_v49 = vsel %vm1188_vm9, %v3385_v17, %v1754_v51  ;;  %v1696_v50 = vrot.slane %v3384_v40, 4  ;;  %v1699_v48 = vsel %vm1188_vm9, %v3384_v40, %v1698_v42 }
 0x425   : > { %v1763_v43 = vperm.slane %v1755_v49, %v4215_v14  ;;  %v1707_v53 = vperm.slane %v1699_v48, %v4215_v14 }
 0x426   : > { %v1753_v58 = vsel %vm1188_vm9, %v1752_v46, %v3375_v0  ;;  %v1697_v59 = vsel %vm1188_vm9, %v1696_v50, %v3374_v35 }
 0x427   : > { %v1759_v26 = vperm.slane %v1753_v58, %v4215_v14  ;;  %v1776_v61 = vrot.slane %v1763_v43, 4  ;;  %v1779_v63 = vsel %vm1188_vm9, %v1763_v43, %v1778_v21  ;;  %v1703_v3 = vperm.slane %v1697_v59, %v4215_v14 }
 0x428   : > { %v1787_v1 = vperm.slane %v1779_v63, %v4226_v30  ;;  %v1720_v2 = vrot.slane %v1707_v53, 4  ;;  %v1723_v6 = vsel %vm1188_vm9, %v1707_v53, %v1722_v7 }
 0x429   : > { %v1764_v9 = vrot.slane %v1759_v26, 4  ;;  %v1767_v10 = vsel %vm1188_vm9, %v1759_v26, %v1766_v20  ;;  %v1777_v34 = vsel %vm1188_vm9, %v1776_v61, %v1751_v38  ;;  %v1708_v13 = vrot.slane %v1703_v3, 4 }
 0x42a   : > { %v1775_v47 = vperm.slane %v1767_v10, %v4226_v30  ;;  %v1783_v15 = vperm.slane %v1777_v34, %v4226_v30  ;;  %v1794_v18 = vrot.slane %v1787_v1, 4  ;;  %v1711_v56 = vsel %vm1188_vm9, %v1703_v3, %v1710_v33 }
 0x42b   : > { %v1765_v8 = vsel %vm1188_vm9, %v1764_v9, %v1747_v37  ;;  %v1709_v57 = vsel %vm1188_vm9, %v1708_v13, %v1691_v41  ;;  %v1719_v22 = vperm.slane %v1711_v56, %v4226_v30  ;;  %v1721_v25 = vsel %vm1188_vm9, %v1720_v2, %v1695_v39 }
 0x42c   : > { %v1771_v45 = vperm.slane %v1765_v8, %v4226_v30  ;;  %v1790_v55 = vrot.slane %v1775_v47, 4  ;;  %v1792_v44 = vrot.slane %v1783_v15, 4  ;;  %v1795_v60 = vsel %vm1188_vm9, 0.0, %v1794_v18 }
 0x42d   : > { %v1861_v27 = vsel %vm1188_vm9, %v1794_v18, %v1783_v15  ;;  %v1866_v28 = vrot.slane %v1795_v60, 4  ;;  %v1715_v29 = vperm.slane %v1709_v57, %v4226_v30  ;;  %v1727_v23 = vperm.slane %v1721_v25, %v4226_v30 }
 0x42e   : > { %v1788_v31 = vrot.slane %v1771_v45, 4  ;;  %v1791_v0 = vsel %vm1188_vm9, 0.0, %v1790_v55  ;;  %v1793_v35 = vsel %vm1188_vm9, 0.0, %v1792_v44  ;;  %v1865_v36 = vperm.slane %v1861_v27, %v4215_v14 }
 0x42f   : > { %v1855_v19 = vrot.slane %v1791_v0, 4  ;;  %v1731_v37 = vperm.slane %v1723_v6, %v4226_v30  ;;  %v1732_v38 = vrot.slane %v1715_v29, 4  ;;  %v1734_v39 = vrot.slane %v1719_v22, 4 }
 0x430   : > { %v1736_v32 = vrot.slane %v1727_v23, 4  ;;  %v1789_v51 = vsel %vm1188_vm9, 0.0, %v1788_v31  ;;  %v1850_v42 = vsel %vm1188_vm9, %v1790_v55, %v1771_v45  ;;  %v1867_v17 = vsel %vm1188_vm9, %v1866_v28, %v1793_v35 }
 0x431   : > { %v1735_v40 = vsel %vm1188_vm9, 0.0, %v1734_v39  ;;  %v1738_v41 = vrot.slane %v1731_v37, 4  ;;  %v1733_v46 = vsel %vm1188_vm9, 0.0, %v1732_v38  ;;  %v1796_v49 = vsel %vm1188_vm9, %v1734_v39, %v1715_v29 }
 0x432   : > { %v1737_v50 = vsel %vm1188_vm9, 0.0, %v1736_v32  ;;  %v1801_v48 = vrot.slane %v1735_v40, 4  ;;  %v1800_v21 = vperm.slane %v1796_v49, %v4215_v14  ;;  %v1854_v43 = vperm.slane %v1850_v42, %v4215_v14 }
 0x433   : > { %v1739_v53 = vsel %vm1188_vm9, 0.0, %v1738_v41  ;;  %v1807_v20 = vsel %vm1188_vm9, %v1738_v41, %v1727_v23  ;;  %v1856_v7 = vsel %vm1188_vm9, %v1855_v19, %v1789_v51  ;;  %v1871_v58 = vperm.slane %v1867_v17, %v4215_v14 }
 0x434   : > { %v1811_v59 = vperm.slane %v1807_v20, %v4215_v14  ;;  %v1812_v26 = vrot.slane %v1739_v53, 4  ;;  %v1802_v61 = vsel %vm1188_vm9, %v1801_v48, %v1733_v46  ;;  %v1820_v63 = vrot.slane %v1800_v21, 4 }
 0x435   : > { %v1806_v3 = vperm.slane %v1802_v61, %v4215_v14  ;;  %v1860_v33 = vperm.slane %v1856_v7, %v4215_v14  ;;  %v1874_v1 = vrot.slane %v1854_v43, 4  ;;  %v1886_v2 = vrot.slane %v1865_v36, 4 }
 0x436   : > { %v1813_v6 = vsel %vm1188_vm9, %v1812_v26, %v1737_v50  ;;  %v1832_v9 = vrot.slane %v1811_v59, 4  ;;  %v1884_v10 = vrot.slane %v1871_v58, 4 }
 0x437   : > { %v1817_v34 = vperm.slane %v1813_v6, %v4215_v14  ;;  %v1821_v13 = vsel %vm1188_vm9, %v1806_v3, %v1820_v63  ;;  %v1875_v47 = vsel %vm1188_vm9, %v1860_v33, %v1874_v1  ;;  %v1887_v15 = vsel %vm1188_vm9, %v1871_v58, %v1886_v2 }
 0x438   : > { %v1829_v18 = vperm.slane %v1821_v13, %v4226_v30  ;;  %v1883_v56 = vperm.slane %v1875_v47, %v4226_v30  ;;  %v1895_v8 = vperm.slane %v1887_v15, %v4226_v30  ;;  %v1818_v57 = vrot.slane %v1806_v3, 4 }
 0x439   : > { %v1833_v22 = vsel %vm1188_vm9, %v1817_v34, %v1832_v9  ;;  %v1830_v25 = vrot.slane %v1817_v34, 4  ;;  %v1872_v45 = vrot.slane %v1860_v33, 4  ;;  %v1885_v55 = vsel %vm1188_vm9, %v1884_v10, %v1865_v36 }
 0x43a   : > { %v1841_v44 = vperm.slane %v1833_v22, %v4226_v30  ;;  %v1900_v60 = vrot.slane %v1895_v8, 4  ;;  %v1819_v27 = vsel %vm1188_vm9, %v1818_v57, %v1800_v21  ;;  %v1848_v28 = vrot.slane %v1829_v18, 4 }
 0x43b   : > { %v1825_v29 = vperm.slane %v1819_v27, %v4226_v30  ;;  %v1831_v23 = vsel %vm1188_vm9, %v1830_v25, %v1811_v59  ;;  %v1873_v31 = vsel %vm1188_vm9, %v1872_v45, %v1854_v43  ;;  %v1891_v0 = vperm.slane %v1885_v55, %v4226_v30 }
 0x43c   : > { %v1846_v35 = vrot.slane %v1841_v44, 4  ;;  %v1901_v19 = vsel %vm1188_vm9, %v1900_v60, %v1883_v56  ;;  %v1837_v37 = vperm.slane %v1831_v23, %v4226_v30  ;;  %v1849_v36 = vsel %vm1188_vm9, %v1841_v44, %v1848_v28 }
 0x43d   : > { %v1910_v38 = vpack.c.bf16 %v1901_v19, %v1901_v19  ;;  %v1907_v39 = vpack.c.bf16 %v1849_v36, %v1849_v36  ;;  %v1879_v32 = vperm.slane %v1873_v31, %v4226_v30  ;;  %v1896_v51 = vrot.slane %v1891_v0, 4 }
 0x43e   : > { %v1847_v42 = vsel %vm1188_vm9, %v1846_v35, %v1829_v18  ;;  %v1842_v17 = vrot.slane %v1837_v37, 4  ;;  %v1902_v40 = vrot.slane %v1883_v56, 4  ;;  %v1844_v41 = vrot.slane %v1825_v29, 4 }
 0x43f   : > { %v1906_v46 = vpack.c.bf16 %v1847_v42, %v1847_v42  ;;  %v2280_v49 = vsel %vm2164_vm11, %v1910_v38, 0  ;;  %v2223_v50 = vsel %vm2164_vm11, %v1907_v39, 0  ;;  %v1897_v48 = vsel %vm1188_vm9, %v1896_v51, %v1879_v32 }
 0x440   : > { %v1843_v21 = vsel %vm1188_vm9, %v1842_v17, %v1825_v29  ;;  %2232 = vmatpush.bf16.msrb.mxu2 %v2223_v50  ;;  %v1908_v43 = vpack.c.bf16 %v1897_v48, %v1897_v48  ;;  %v1903_v53 = vsel %vm1188_vm9, %v1895_v8, %v1902_v40  ;;  %v1845_v20 = vsel %vm1188_vm9, %v1837_v37, %v1844_v41 }
 0x441   : > { %v2204_v7 = vsel %vm2164_vm11, %v1906_v46, 0  ;;  %v1904_v58 = vpack.c.bf16 %v1843_v21, %v1843_v21  ;;  %v1911_v59 = vpack.c.bf16 %v1903_v53, %v1903_v53  ;;  %v1905_v26 = vpack.c.bf16 %v1845_v20, %v1845_v20 }
 0x442   : > { %2213 = vmatpush.bf16.msrb.mxu1 %v2204_v7  ;;  %v2242_v61 = vsel %vm2164_vm11, %v1908_v43, 0  ;;  %v1898_v63 = vrot.slane %v1879_v32, 4 }
 0x443   : > { %v2166_v3 = vsel %vm2164_vm11, %v1904_v58, 0  ;;  %v2299_v33 = vsel %vm2164_vm11, %v1911_v59, 0  ;;  %v2185_v1 = vsel %vm2164_vm11, %v1905_v26, 0 }
 0x444   : > { %2175 = vmatpush.bf16.msra.mxu3 %v2166_v3  ;;  %2308 = vmatpush.bf16.msra.mxu2 %v2299_v33  ;;  %v1899_v2 = vsel %vm1188_vm9, %v1891_v0, %v1898_v63 }
 0x445   : > { %2194 = vmatpush.bf16.msrb.mxu0 %v2185_v1  ;;  %v1909_v6 = vpack.c.bf16 %v1899_v2, %v1899_v2 }
 0x446   : > { %2289 = vmatpush.bf16.msra.mxu1 %v2280_v49 }
 0x447   : > { %v2261_v9 = vsel %vm2164_vm11, %v1909_v6, 0 }
 0x448   : > { %2251 = vmatpush.bf16.msrb.mxu3 %v2242_v61 }
 0x449   : > { %2270 = vmatpush.bf16.msra.mxu0 %v2261_v9 }
 0x470   : > { %v2121_v10 = vpop.xlane.xlu1 %2120 }
 0x471   : > { %3433 = vrcp.f32 %v2121_v10 }
 0x474   : > { %v2124_v34 = vpop.xlane.xlu2 %2123 }
 0x475   : > { %3435 = vrcp.f32 %v2124_v34 }
 0x477   : > { %v3434_v13 = vpop.eup %3433 }
 0x478   : > { %v2147_v47 = vmul.f32 %v3434_v13, %v4504_v54 }
 0x479   : > { %v2115_v15 = vpop.xlane.xlu0 %2114 }
 0x47a   : > { %v2155_v18 = vpack.c.bf16 %v2147_v47, %v2147_v47  ;;  %3437 = vrcp.f32 %v2115_v15 }
 0x47b   : > { %v3436_v56 = vpop.eup %3435 }
 0x47c   : > { %v2148_v8 = vmul.f32 %v3436_v56, %v4508_v52  ;;  %3198 = vmatmul.msk.bf16.vlgmr.msrb.gmra.mxu1 %vm1912_vm10, %v2155_v18 }
 0x47e   : > { %v2156_v57 = vpack.c.bf16 %v2148_v8, %v2148_v8 }
 0x480   : > { %v3438_v22 = vpop.eup %3437  ;;  %3199 = vmatmul.msk.bf16.vlgmr.msrb.gmra.mxu2 %vm1912_vm10, %v2156_v57 }
 0x481   : > { %v2145_v25 = vmul.f32 %v3438_v22, %v4512_v5  ;;  %v2118_v45 = vpop.xlane.xlu0 %2117  ;;  %v2133_v55 = vpop.xlane.xlu1 %2132 }
 0x482   : > { %3439 = vrcp.f32 %v2118_v45 }
 0x483   : > { %v2153_v44 = vpack.c.bf16 %v2145_v25, %v2145_v25  ;;  %3441 = vrcp.f32 %v2133_v55 }
 0x485   : > { %3196 = vmatmul.msk.bf16.vlgmr.msra.gmra.mxu3 %vm1912_vm10, %v2153_v44 }
 0x488   : > { %v3440_v54 = vpop.eup %3439 }
 0x489   : > { %v3442_v60 = vpop.eup %3441  ;;  %v2146_v27 = vmul.f32 %v3440_v54, %v4516_v16  ;;  %v2136_v52 = vpop.xlane.xlu0 %2135 }
 0x48a   : > { %v2151_v28 = vmul.f32 %v3442_v60, %v4518_v11  ;;  %3443 = vrcp.f32 %v2136_v52  ;;  %v2127_v23 = vpop.xlane.xlu2 %2126 }
 0x48b   : > { %v2154_v29 = vpack.c.bf16 %v2146_v27, %v2146_v27  ;;  %3445 = vrcp.f32 %v2127_v23 }
 0x48c   : > { %v2159_v31 = vpack.c.bf16 %v2151_v28, %v2151_v28 }
 0x48d   : > { %3197 = vmatmul.msk.bf16.vlgmr.msrb.gmra.mxu0 %vm1912_vm10, %v2154_v29 }
 0x48e   : > { %3202 = vmatmul.msk.bf16.vlgmr.msra.gmra.mxu1 %vm1912_vm10, %v2159_v31 }
 0x490   : > { %v3444_v5 = vpop.eup %3443 }
 0x491   : > { %v2152_v0 = vmul.f32 %v3444_v5, %v4525_v4  ;;  %v3446_v35 = vpop.eup %3445 }
 0x492   : > { %v2149_v37 = vmul.f32 %v3446_v35, %v4529_v24  ;;  %v2130_v16 = vpop.xlane.xlu2 %2129 }
 0x493   : > { %v2160_v19 = vpack.c.bf16 %v2152_v0, %v2152_v0  ;;  %3447 = vrcp.f32 %v2130_v16 }
 0x494   : > { %v2157_v36 = vpack.c.bf16 %v2149_v37, %v2149_v37 }
 0x495   : > { %3203 = vmatmul.msk.bf16.vlgmr.msra.gmra.mxu2 %vm1912_vm10, %v2160_v19 }
 0x496   : > { %3200 = vmatmul.msk.bf16.vlgmr.msrb.gmra.mxu3 %vm1912_vm10, %v2157_v36 }
 0x499   : > { %v3448_v11 = vpop.eup %3447 }
 0x49a   : > { %v2150_v38 = vmul.f32 %v3448_v11, %v4534_v62 }
 0x49c   : > { %v2158_v39 = vpack.c.bf16 %v2150_v38, %v2150_v38 }
 0x49e   : > { %3201 = vmatmul.msk.bf16.vlgmr.msra.gmra.mxu0 %vm1912_vm10, %v2158_v39 }
 0x4f9   : > { %v2215_v32 = vpop.f32.mrf.mxu1 }
 0x4fa   : > { %v2314_v42 = vrot.slane %v2215_v32, 4 }
 0x501   : > { %v2217_v51 = vpop.f32.mrf.mxu1 }
 0x503   : > { %v2234_v4 = vpop.f32.mrf.mxu2 }
 0x504   : > { %v2326_v40 = vrot.slane %v2234_v4, 4 }
 0x508   : > { %v2177_v17 = vpop.f32.mrf.mxu3 }
 0x509   : > { %v2315_v24 = vsel %vm1188_vm9, %v2314_v42, %v2177_v17  ;;  %v2316_v41 = vrot.slane %v2177_v17, 4 }
 0x50a   : > { %v2321_v46 = vperm.slane %v2315_v24, %v4215_v14  ;;  %v2196_v49 = vpop.f32.mrf.mxu0 }
 0x50b   : > { %v2317_v50 = vsel %vm1188_vm9, %v2215_v32, %v2316_v41  ;;  %v2327_v48 = vsel %vm1188_vm9, %v2326_v40, %v2196_v49  ;;  %v2328_v62 = vrot.slane %v2196_v49, 4  ;;  %v2291_v21 = vpop.f32.mrf.mxu1  ;;  %v2236_v43 = vpop.f32.mrf.mxu2 }
 0x50c   : > { %v2325_v53 = vperm.slane %v2317_v50, %v4215_v14  ;;  %v2340_v20 = vrot.slane %v2321_v46, 4  ;;  %v2333_v7 = vperm.slane %v2327_v48, %v4215_v14  ;;  %v2370_v31 = vrot.slane %v2291_v21, 4 }
 0x50d   : > { %v2329_v58 = vsel %vm1188_vm9, %v2234_v4, %v2328_v62 }
 0x50e   : > { %v2352_v59 = vrot.slane %v2325_v53, 4  ;;  %v2337_v26 = vperm.slane %v2329_v58, %v4215_v14  ;;  %v2338_v61 = vrot.slane %v2333_v7, 4  ;;  %v2341_v63 = vsel %vm1188_vm9, %v2333_v7, %v2340_v20 }
 0x50f   : > { %v2349_v3 = vperm.slane %v2341_v63, %v4226_v30 }
 0x510   : > { %v2339_v33 = vsel %vm1188_vm9, %v2338_v61, %v2321_v46  ;;  %v2350_v1 = vrot.slane %v2337_v26, 4  ;;  %v2353_v2 = vsel %vm1188_vm9, %v2337_v26, %v2352_v59  ;;  %v2179_v6 = vpop.f32.mrf.mxu3 }
 0x511   : > { %v2345_v9 = vperm.slane %v2339_v33, %v4226_v30  ;;  %v2361_v10 = vperm.slane %v2353_v2, %v4226_v30  ;;  %v2364_v34 = vrot.slane %v2349_v3, 4 }
 0x512   : > { %v2351_v13 = vsel %vm1188_vm9, %v2350_v1, %v2325_v53  ;;  %v2198_v47 = vpop.f32.mrf.mxu0 }
 0x513   : > { %v2357_v15 = vperm.slane %v2351_v13, %v4226_v30  ;;  %v2362_v18 = vrot.slane %v2345_v9, 4  ;;  %v2365_v56 = vsel %vm1188_vm9, 0.0, %v2364_v34  ;;  %v2368_v8 = vrot.slane %v2361_v10, 4  ;;  %v2293_v57 = vpop.f32.mrf.mxu1 }
 0x514   : > { %v2431_v22 = vrot.slane %v2365_v56, 4  ;;  %v2426_v60 = vsel %vm1188_vm9, %v2364_v34, %v2345_v9 }
 0x515   : > { %v2363_v25 = vsel %vm1188_vm9, 0.0, %v2362_v18  ;;  %v2366_v45 = vrot.slane %v2357_v15, 4  ;;  %v2369_v55 = vsel %vm1188_vm9, 0.0, %v2368_v8  ;;  %v2437_v52 = vsel %vm1188_vm9, %v2368_v8, %v2357_v15 }
 0x516   : > { %v2432_v44 = vsel %vm1188_vm9, %v2431_v22, %v2363_v25  ;;  %v2442_v54 = vrot.slane %v2369_v55, 4  ;;  %v2430_v35 = vperm.slane %v2426_v60, %v4215_v14  ;;  %v2441_v36 = vperm.slane %v2437_v52, %v4215_v14 }
 0x517   : > { %v2367_v27 = vsel %vm1188_vm9, 0.0, %v2366_v45  ;;  %v2436_v23 = vperm.slane %v2432_v44, %v4215_v14 }
 0x518   : > { %v2310_v28 = vpop.f32.mrf.mxu2  ;;  %v2443_v29 = vsel %vm1188_vm9, %v2442_v54, %v2367_v27  ;;  %v2450_v17 = vrot.slane %v2430_v35, 4  ;;  %v2462_v49 = vrot.slane %v2441_v36, 4 }
 0x519   : > { %v2382_v5 = vrot.slane %v2310_v28, 4  ;;  %v2447_v0 = vperm.slane %v2443_v29, %v4215_v14  ;;  %v2253_v19 = vpop.f32.mrf.mxu3  ;;  %v2448_v42 = vrot.slane %v2436_v23, 4 }
 0x51a   : > { %v2371_v37 = vsel %vm1188_vm9, %v2370_v31, %v2253_v19  ;;  %v2372_v16 = vrot.slane %v2253_v19, 4  ;;  %v2451_v3 = vsel %vm1188_vm9, %v2436_v23, %v2450_v17 }
 0x51b   : > { %v2460_v11 = vrot.slane %v2447_v0, 4  ;;  %v2377_v38 = vperm.slane %v2371_v37, %v4215_v14  ;;  %v2272_v39 = vpop.f32.mrf.mxu0  ;;  %v2449_v7 = vsel %vm1188_vm9, %v2448_v42, %v2430_v35  ;;  %v2463_v34 = vsel %vm1188_vm9, %v2447_v0, %v2462_v49 }
 0x51c   : > { %v2373_v32 = vsel %vm1188_vm9, %v2291_v21, %v2372_v16  ;;  %v2383_v51 = vsel %vm1188_vm9, %v2382_v5, %v2272_v39  ;;  %v2384_v4 = vrot.slane %v2272_v39, 4  ;;  %v2455_v13 = vperm.slane %v2449_v7, %v4226_v30 }
 0x51d   : > { %v2381_v40 = vperm.slane %v2373_v32, %v4215_v14  ;;  %v2396_v24 = vrot.slane %v2377_v38, 4  ;;  %v2389_v41 = vperm.slane %v2383_v51, %v4215_v14  ;;  %v2461_v50 = vsel %vm1188_vm9, %v2460_v11, %v2441_v36 }
 0x51e   : > { %v2385_v46 = vsel %vm1188_vm9, %v2310_v28, %v2384_v4  ;;  %v2467_v58 = vperm.slane %v2461_v50, %v4226_v30  ;;  %v2459_v22 = vperm.slane %v2451_v3, %v4226_v30  ;;  %v2471_v28 = vperm.slane %v2463_v34, %v4226_v30 }
 0x51f   : > { %v2408_v48 = vrot.slane %v2381_v40, 4  ;;  %v2393_v62 = vperm.slane %v2385_v46, %v4215_v14  ;;  %v2394_v43 = vrot.slane %v2389_v41, 4  ;;  %v2397_v21 = vsel %vm1188_vm9, %v2389_v41, %v2396_v24 }
 0x520   : > { %v2312_v53 = vpop.f32.mrf.mxu2  ;;  %v2405_v20 = vperm.slane %v2397_v21, %v4226_v30  ;;  %v2472_v6 = vrot.slane %v2467_v58, 4  ;;  %v2478_v0 = vrot.slane %v2459_v22, 4  ;;  %v2476_v39 = vrot.slane %v2471_v28, 4 }
 0x521   : > { %v2395_v59 = vsel %vm1188_vm9, %v2394_v43, %v2377_v38  ;;  %v2406_v26 = vrot.slane %v2393_v62, 4  ;;  %v2409_v61 = vsel %vm1188_vm9, %v2393_v62, %v2408_v48  ;;  %v2255_v63 = vpop.f32.mrf.mxu3  ;;  %v2474_v17 = vrot.slane %v2455_v13, 4 }
 0x522   : > { %v2401_v33 = vperm.slane %v2395_v59, %v4226_v30  ;;  %v2417_v1 = vperm.slane %v2409_v61, %v4226_v30  ;;  %v2420_v2 = vrot.slane %v2405_v20, 4  ;;  %v4699_v25 = vsel %vm1188_vm9, %v2472_v6, %v2455_v13  ;;  %v3259_v61 = vld [vmem:[%s4955_s5] sm:$0xff] }
 0x523   : > { %v2407_v9 = vsel %vm1188_vm9, %v2406_v26, %v2381_v40  ;;  %v2274_v10 = vpop.f32.mrf.mxu0  ;;  %v2477_v62 = vsel %vm1188_vm9, %v2476_v39, %v2459_v22  ;;  %v2475_v21 = vsel %vm1188_vm9, %v2467_v58, %v2474_v17 }
 0x524   : > { %v2413_v47 = vperm.slane %v2407_v9, %v4226_v30  ;;  %v2418_v15 = vrot.slane %v2401_v33, 4  ;;  %v2421_v18 = vsel %vm1188_vm9, 0.0, %v2420_v2  ;;  %v2424_v56 = vrot.slane %v2417_v1, 4 }
 0x525   : > { %v2480_v8 = vsel %vm1188_vm9, %v2420_v2, %v2401_v33  ;;  %v2485_v57 = vrot.slane %v2421_v18, 4 }
 0x526   : > { %v2419_v45 = vsel %vm1188_vm9, 0.0, %v2418_v15  ;;  %v2422_v55 = vrot.slane %v2413_v47, 4  ;;  %v2425_v44 = vsel %vm1188_vm9, 0.0, %v2424_v56  ;;  %v2484_v54 = vperm.slane %v2480_v8, %v4215_v14 }
 0x527   : > { %v2486_v60 = vsel %vm1188_vm9, %v2485_v57, %v2419_v45  ;;  %v2491_v27 = vsel %vm1188_vm9, %v2424_v56, %v2413_v47  ;;  %v2496_v52 = vrot.slane %v2425_v44, 4  ;;  %v3406_v57 = vld [vmem:[%s970_s0] ss:$0 sm:$0xff]  ;;  %s4957_s0 = scalar_lea.vmem [#allocation12], %s4082_s17  ;;  %s4959_s17 = scalar_lea.vmem [#allocation11], %s4074_s16 }
 0x528   : > { %v2490_v29 = vperm.slane %v2486_v60, %v4215_v14  ;;  %v2504_v23 = vrot.slane %v2484_v54, 4  ;;  %v2423_v31 = vsel %vm1188_vm9, 0.0, %v2422_v55  ;;  %v2495_v5 = vperm.slane %v2491_v27, %v4215_v14  ;;  %v3453_v55 = vld [vmem:[#allocation2] sm:$0xff]  ;;  %v3454_v27 = vld [vmem:[#allocation2 + $0x8] sm:$0xff]  ;;  %s4958_s3 = smov %s4957_s0 }
 0x529   : > { %v2497_v35 = vsel %vm1188_vm9, %v2496_v52, %v2423_v31 }
 0x52a   : > { %v2501_v19 = vperm.slane %v2497_v35, %v4215_v14  ;;  %v2505_v37 = vsel %vm1188_vm9, %v2490_v29, %v2504_v23  ;;  %v2516_v16 = vrot.slane %v2495_v5, 4  ;;  %v2502_v36 = vrot.slane %v2490_v29, 4 }
 0x52b   : > { %v2513_v11 = vperm.slane %v2505_v37, %v4226_v30  ;;  %v2479_v14 = vsel %vm1188_vm9, %v2471_v28, %v2478_v0 }
 0x52c   : > { %v2517_v38 = vsel %vm1188_vm9, %v2501_v19, %v2516_v16  ;;  %v2503_v32 = vsel %vm1188_vm9, %v2502_v36, %v2484_v54  ;;  %v2514_v51 = vrot.slane %v2501_v19, 4 }
 0x52d   : > { %v2525_v4 = vperm.slane %v2517_v38, %v4226_v30  ;;  %v2532_v42 = vrot.slane %v2513_v11, 4  ;;  %v2509_v40 = vperm.slane %v2503_v32, %v4226_v30  ;;  %v3262_v32 = vld [vmem:[%s4957_s0 + $0x8] sm:$0xff] }
 0x52e   : > { %v2515_v24 = vsel %vm1188_vm9, %v2514_v51, %v2495_v5  ;;  %2692 = vmatpush.bf16.msrb.mxu0 %v3262_v32  ;;  %v3261_v51 = vld [vmem:[%s4958_s3] sm:$0xff] }
 0x52f   : > { %v2533_v41 = vsel %vm1188_vm9, %v2525_v4, %v2532_v42  ;;  %v2530_v46 = vrot.slane %v2525_v4, 4  ;;  %v2521_v49 = vperm.slane %v2515_v24, %v4226_v30  ;;  %v2528_v50 = vrot.slane %v2509_v40, 4  ;;  %v3260_v30 = vld [vmem:[%s4954_s26 + $0x8] sm:$0xff] }
 0x530   : > { %v3396_v48 = vpack.i.bf16 %v2533_v41, %v2479_v14  ;;  %2596 = vmatpush.bf16.msra.mxu3 %v3260_v30  ;;  %v3408_v30 = vld [vmem:[%s973_s9] ss:$0 sm:$0xff] }
 0x531   : > { %v2531_v43 = vsel %vm1188_vm9, %v2530_v46, %v2513_v11  ;;  %v2526_v53 = vrot.slane %v2521_v49, 4  ;;  %v2529_v20 = vsel %vm1188_vm9, %v2521_v49, %v2528_v50 }
 0x532   : > { %3397 = vrot.lane.b32.xlu2 %v3396_v48, %s3764_s30  ;;  %v3391_v7 = vpack.i.bf16 %v2531_v43, %v2477_v62  ;;  %v3386_v59 = vpack.i.bf16 %v2529_v20, %v2475_v21  ;;  %2693 = vmatpush.bf16.msrb.mxu0 %v3261_v51  ;;  %v3407_v20 = vld [vmem:[%s4959_s17] ss:$0 sm:$0xff] }
 0x533   : > { %v2527_v26 = vsel %vm1188_vm9, %v2526_v53, %v2509_v40 }
 0x534   : > { %3392 = vrot.lane.b32.xlu1 %v3391_v7, %s3765_s18  ;;  %3387 = vrot.lane.b32.xlu0 %v3386_v59, %s3766_s4 }
 0x535   : > { %2597 = vmatpush.bf16.msra.mxu3 %v3259_v61 }
 0x58c   : > { %v3398_v58 = vpop.permute.xlu2 %3397 }
 0x58d   : > { %v3400_v9 = vunpack.i.h.bf16 %v3398_v58  ;;  %v3399_v10 = vunpack.i.l.bf16 %v3398_v58 }
 0x5a6   : > { %v3393_v63 = vpop.permute.xlu1 %3392  ;;  %v3388_v3 = vpop.permute.xlu0 %3387 }
 0x5a7   : > { %v3395_v33 = vunpack.i.h.bf16 %v3393_v63  ;;  %v3394_v1 = vunpack.i.l.bf16 %v3393_v63  ;;  %v3390_v2 = vunpack.i.h.bf16 %v3388_v3  ;;  %v3389_v6 = vunpack.i.l.bf16 %v3388_v3 }
 0x5a9   : > { %v2558_v34 = vsel %vm1912_vm10, %v4699_v25, %v3389_v6  ;;  %v2559_v13 = vsel %vm1912_vm10, %v2527_v26, %v3390_v2  ;;  %v3266_v2 = vld [vmem:[%s4149_s27 + $0x18] sm:$0xff]  ;;  %v3265_v6 = vld [vmem:[%s4149_s27 + $0x10] sm:$0xff] }
 0x5aa   : > { %v2561_v47 = vsel %vm2560_vm12, %v2558_v34, %v3394_v1  ;;  %v2562_v15 = vsel %vm2560_vm12, %v2559_v13, %v3395_v33  ;;  %2747 = vmatpush.bf16.msrb.mxu1 %v3266_v2  ;;  %v3409_v13 = vld [vmem:[%s976_s10] ss:$0 sm:$0xff] }
 0x5ab   : > { %v2564_v18 = vsel %vm2563_vm13, %v2561_v47, %v3399_v10  ;;  %v2565_v56 = vsel %vm2563_vm13, %v2562_v15, %v3400_v9  ;;  %v3264_v9 = vld [vmem:[%s4149_s27 + $0x8] sm:$0xff]  ;;  %v3263_v10 = vld [vmem:[%s4149_s27] sm:$0xff] }
 0x5ac   : > { %v2566_v8 = vpack.c.bf16 %v2565_v56, %v2564_v18 }
 0x5ae   : > { %3212 = vmatmul.msk.bf16.vlgmr.msra.gmra.mxu3 %vm999_vm1, %v2566_v8  ;;  %2748 = vmatpush.bf16.msrb.mxu1 %v3265_v6 }
 0x5b2   : > { %2749 = vmatpush.bf16.msrb.mxu1 %v3264_v9 }
 0x5b6   : > { %2750 = vmatpush.bf16.msrb.mxu1 %v3263_v10 }
 0x631   : > { %v2599_v22 = vpop.f32.mrf.mxu3 }
 0x632   : > { %v2600_v45 = vadd.f32 %v3406_v57, %v2599_v22  ;;  %v3410_v22 = vld [vmem:[%s984_s7] ss:$0 sm:$0xff] }
 0x634   : > { %v4741_v44 = vadd.f32 %v3453_v55, %v2600_v45 }
 0x636   : > { %v2608_v25 = vsel %vm999_vm1, %v4741_v44, 0.0 }
 0x637   : > { %2609 = vadd.xlane.f32.xlu0 %v2608_v25 }
 0x639   : > { %v2601_v54 = vpop.f32.mrf.mxu3 }
 0x63a   : > { %v2602_v60 = vadd.f32 %v3406_v57, %v2601_v54 }
 0x63c   : > { %v4745_v52 = vadd.f32 %v3454_v27, %v2602_v60 }
 0x63e   : > { %v2611_v28 = vsel %vm999_vm1, %v4745_v52, 0.0 }
 0x63f   : > { %2612 = vadd.xlane.f32.xlu1 %v2611_v28 }
 0x6aa   : > { %v2610_v29 = vpop.xlane.xlu0 %2609 }
 0x6ab   : > { %v2614_v23 = vmul.f32 %v2610_v29, %v4158_v12 }
 0x6ad   : > { %v2616_v31 = vsub.f32 %v4741_v44, %v2614_v23 }
 0x6af   : > { %v2618_v5 = vmul.f32 %v2616_v31, %v2616_v31 }
 0x6b1   : > { %v2620_v0 = vsel %vm999_vm1, %v2618_v5, 0.0 }
 0x6b2   : > { %v2613_v35 = vpop.xlane.xlu1 %2612  ;;  %2621 = vadd.xlane.f32.xlu2 %v2620_v0 }
 0x6b3   : > { %v2615_v19 = vmul.f32 %v2613_v35, %v4158_v12 }
 0x6b5   : > { %v2617_v37 = vsub.f32 %v4745_v52, %v2615_v19 }
 0x6b7   : > { %v2619_v16 = vmul.f32 %v2617_v37, %v2617_v37 }
 0x6b9   : > { %v2623_v36 = vsel %vm999_vm1, %v2619_v16, 0.0 }
 0x6ba   : > { %2624 = vadd.xlane.f32.xlu0 %v2623_v36 }
 0x725   : > { %v2622_v11 = vpop.xlane.xlu2 %2621 }
 0x726   : > { %v2626_v38 = vmul.f32 %v2622_v11, %v4158_v12 }
 0x728   : > { %v2628_v39 = vadd.f32 1e-06, %v2626_v38 }
 0x72a   : > { %3449 = vrsqrt.f32 %v2628_v39  ;;  %vm2636_vm15 = vweird.f32 %v2628_v39 }
 0x72d   : > { %v2625_v4 = vpop.xlane.xlu0 %2624 }
 0x72e   : > { %v2627_v42 = vmul.f32 %v2625_v4, %v4158_v12 }
 0x730   : > { %v3450_v17 = vpop.eup %3449  ;;  %v2629_v40 = vadd.f32 1e-06, %v2627_v42 }
 0x731   : > { %v2631_v14 = vmul.f32 %v3450_v17, %v2628_v39  ;;  %vm2637_vm14 = vweird.f32 %v3450_v17 }
 0x732   : > { %3451 = vrsqrt.f32 %v2629_v40  ;;  %vm2638_vm0 = vmor %vm2636_vm15, %vm2637_vm14  ;;  %vm2646_vm3 = vweird.f32 %v2629_v40 }
 0x733   : > { %v2632_v24 = vmul.f32 %v3450_v17, %v2631_v14 }
 0x735   : > { %v2633_v41 = vmul.f32 0.5, %v2632_v24 }
 0x737   : > { %v2634_v46 = vsub.f32 1.5, %v2633_v41 }
 0x738   : > { %v3452_v49 = vpop.eup %3451 }
 0x739   : > { %v2635_v50 = vmul.f32 %v3450_v17, %v2634_v46  ;;  %v2641_v48 = vmul.f32 %v3452_v49, %v2629_v40  ;;  %vm2647_vm2 = vweird.f32 %v3452_v49 }
 0x73a   : > { %vm2648_vm4 = vmor %vm2646_vm3, %vm2647_vm2 }
 0x73b   : > { %v2642_v62 = vmul.f32 %v3452_v49, %v2641_v48  ;;  %v2639_v43 = vsel %vm2638_vm0, %v3450_v17, %v2635_v50 }
 0x73c   : > { %v2650_v7 = vmul.f32 %v2639_v43, %v2616_v31 }
 0x73d   : > { %v2643_v21 = vmul.f32 0.5, %v2642_v62 }
 0x73e   : > { %v2655_v61 = vmul.f32 %v3407_v20, %v2650_v7 }
 0x73f   : > { %v2644_v53 = vsub.f32 1.5, %v2643_v21 }
 0x740   : > { %v2660_v3 = vadd.f32 %v3408_v30, %v2655_v61 }
 0x741   : > { %v2645_v59 = vmul.f32 %v3452_v49, %v2644_v53 }
 0x743   : > { %v2649_v26 = vsel %vm2648_vm4, %v3452_v49, %v2645_v59 }
 0x744   : > { %v2651_v58 = vmul.f32 %v2649_v26, %v2617_v37 }
 0x746   : > { %v2656_v63 = vmul.f32 %v3407_v20, %v2651_v58 }
 0x748   : > { %v2661_v33 = vadd.f32 %v3408_v30, %v2656_v63 }
 0x74a   : > { %v2662_v1 = vpack.c.bf16 %v2661_v33, %v2660_v3 }
 0x74c   : > { %3221 = vmatmul.msk.bf16.vlgmr.msrb.gmra.mxu0 %vm999_vm1, %v2662_v1 }
 0x7c9   : > { %v2695_v34 = vpop.f32.mrf.mxu0 }
 0x7ca   : > { %v2696_v47 = vadd.f32 %v3409_v13, %v2695_v34 }
 0x7cc   : > { %v2700_v56 = vmax.f32 %v2696_v47, 0.0 }
 0x7d1   : > { %v2697_v15 = vpop.f32.mrf.mxu0 }
 0x7d2   : > { %v2698_v18 = vadd.f32 %v3409_v13, %v2697_v15 }
 0x7d4   : > { %v2701_v8 = vmax.f32 %v2698_v18, 0.0 }
 0x7d6   : > { %v2702_v57 = vpack.c.bf16 %v2701_v8, %v2700_v56 }
 0x7d8   : > { %3238 = vmatmul.msk.bf16.vlgmr.msrb.gmra.mxu1 %vm2739_vm5, %v2702_v57 }
 0x855   : > { %v2752_v45 = vpop.f32.mrf.mxu1 }
 0x856   : > { %v2753_v55 = vadd.f32 %v3410_v22, %v2752_v45 }
 0x858   : > { %v2757_v25 = vadd.f32 %v2753_v55, %v4741_v44 }
 0x85a   : > { %2759 = vst.msk [vmem:[#allocation2] sm:$0xff] %vm999_vm1, %v2757_v25 }
 0x85b   : > { %2761 = vst.msk [vmem:[%s4152_s19] sm:$0xff] %vm999_vm1, %v2757_v25 }
 0x85d   : > { %v2754_v54 = vpop.f32.mrf.mxu1 }
 0x85e   : > { %v2755_v60 = vadd.f32 %v3410_v22, %v2754_v54 }
 0x85f   : > { %2766 = sbr.rel (%p3239_p8) target bundleno = 2425 (0x979), region = 128 }
 0x860   : > { %v2758_v27 = vadd.f32 %v2755_v60, %v4745_v52 }
 0x862   : > { %2760 = vst.msk [vmem:[#allocation2 + $0x8] sm:$0xff] %vm999_vm1, %v2758_v27 }
 0x863   : > { %2762 = vst.msk [vmem:[%s4152_s19 + $0x8] sm:$0xff] %vm999_vm1, %v2758_v27 }
 0x864   : > { %v2769_v28 = vsel %vm999_vm1, %v2757_v25, 0.0  ;;  %v2772_v44 = vsel %vm999_vm1, %v2758_v27, 0.0  ;;  %v3455_v49 = vld [vmem:[%s4963_s12] ss:$0 sm:$0xff] }
 0x865   : > { %2770 = vadd.xlane.f32.xlu0 %v2769_v28  ;;  %v3456_v62 = vld [vmem:[%s4964_s8] ss:$0 sm:$0xff] }
 0x86d   : > { %2773 = vadd.xlane.f32.xlu0 %v2772_v44 }
 0x8d8   : > { %v2771_v29 = vpop.xlane.xlu0 %2770 }
 0x8d9   : > { %v2775_v23 = vmul.f32 %v2771_v29, %v4158_v12 }
 0x8db   : > { %v2777_v31 = vsub.f32 %v2757_v25, %v2775_v23 }
 0x8dd   : > { %v2779_v5 = vmul.f32 %v2777_v31, %v2777_v31 }
 0x8df   : > { %v2781_v52 = vsel %vm999_vm1, %v2779_v5, 0.0 }
 0x8e0   : > { %2782 = vadd.xlane.f32.xlu1 %v2781_v52  ;;  %v2774_v0 = vpop.xlane.xlu0 %2773 }
 0x8e1   : > { %v2776_v35 = vmul.f32 %v2774_v0, %v4158_v12 }
 0x8e3   : > { %v2778_v19 = vsub.f32 %v2758_v27, %v2776_v35 }
 0x8e5   : > { %v2780_v37 = vmul.f32 %v2778_v19, %v2778_v19 }
 0x8e7   : > { %v2784_v16 = vsel %vm999_vm1, %v2780_v37, 0.0 }
 0x8e8   : > { %2785 = vadd.xlane.f32.xlu1 %v2784_v16 }
 0x953   : > { %v2783_v36 = vpop.xlane.xlu1 %2782 }
 0x954   : > { %v2787_v11 = vmul.f32 %v2783_v36, %v4158_v12 }
 0x956   : > { %v2789_v38 = vadd.f32 1e-06, %v2787_v11 }
 0x958   : > { %3457 = vrsqrt.f32 %v2789_v38  ;;  %vm2797_vm7 = vweird.f32 %v2789_v38 }
 0x95b   : > { %v2786_v39 = vpop.xlane.xlu1 %2785 }
 0x95c   : > { %v2788_v32 = vmul.f32 %v2786_v39, %v4158_v12 }
 0x95e   : > { %v3458_v51 = vpop.eup %3457  ;;  %v2790_v4 = vadd.f32 1e-06, %v2788_v32 }
 0x95f   : > { %v2792_v42 = vmul.f32 %v3458_v51, %v2789_v38  ;;  %vm2798_vm6 = vweird.f32 %v3458_v51 }
 0x960   : > { %3459 = vrsqrt.f32 %v2790_v4  ;;  %vm2799_vm8 = vmor %vm2797_vm7, %vm2798_vm6  ;;  %vm2807_vm10 = vweird.f32 %v2790_v4 }
 0x961   : > { %v2793_v17 = vmul.f32 %v3458_v51, %v2792_v42 }
 0x963   : > { %v2794_v40 = vmul.f32 0.5, %v2793_v17 }
 0x965   : > { %v2795_v14 = vsub.f32 1.5, %v2794_v40 }
 0x966   : > { %v3460_v24 = vpop.eup %3459 }
 0x967   : > { %v2796_v41 = vmul.f32 %v3458_v51, %v2795_v14  ;;  %v2802_v46 = vmul.f32 %v3460_v24, %v2790_v4  ;;  %vm2808_vm9 = vweird.f32 %v3460_v24 }
 0x968   : > { %vm2809_vm11 = vmor %vm2807_vm10, %vm2808_vm9 }
 0x969   : > { %v2800_v50 = vsel %vm2799_vm8, %v3458_v51, %v2796_v41  ;;  %v2803_v48 = vmul.f32 %v3460_v24, %v2802_v46 }
 0x96a   : > { %v2811_v12 = vmul.f32 %v2800_v50, %v2777_v31 }
 0x96b   : > { %v2804_v43 = vmul.f32 0.5, %v2803_v48 }
 0x96c   : > { %v2816_v21 = vmul.f32 %v3455_v49, %v2811_v12 }
 0x96d   : > { %v2805_v53 = vsub.f32 1.5, %v2804_v43 }
 0x96e   : > { %v2821_v20 = vadd.f32 %v3456_v62, %v2816_v21 }
 0x96f   : > { %v2806_v7 = vmul.f32 %v3460_v24, %v2805_v53 }
 0x970   : > { %2823 = vst.msk [vmem:[#allocation15] sm:$0xff] %vm999_vm1, %v2821_v20 }
 0x971   : > { %v2810_v59 = vsel %vm2809_vm11, %v3460_v24, %v2806_v7 }
 0x972   : > { %v2812_v26 = vmul.f32 %v2810_v59, %v2778_v19 }
 0x974   : > { %v2817_v30 = vmul.f32 %v3455_v49, %v2812_v26 }
 0x976   : > { %v2822_v61 = vadd.f32 %v3456_v62, %v2817_v30 }
 0x978   : > { %2824 = vst.msk [vmem:[#allocation15 + $0x8] sm:$0xff] %vm999_vm1, %v2822_v61 }
 0x979 PF: > { %s3267_s18 = sshll.u32 %s3973_s14, 4  ;;  %s4966_s11 = sld [smem:[#allocation48_spill]] }
 0x97a   : > { %s2838_s22 = sshll.u32 %s4152_s19, 4  ;;  %s2826_s3 = scalar_lea.sflag [#allocation5], %s4074_s16  ;;  %s2839_s22 = int_to_ptr.vmem [resolvable:$true] %s2838_s22 }
 0x97f   : > { %s2837_s13 = scalar_lea.hbm %s4966_s11, %s3267_s18  ;;  %s3661_s9 = scalar_lea.hbm %s4966_s11, 32 }
 0x980   : > { %s2840_s0 = sshll.u32 %s2837_s13, 4  ;;  %s2841_s0 = int_to_ptr.hbm [resolvable:$true] %s2840_s0 }
 0x981   : > { %s3655_s17 = sshra.s32 %s2841_s0, 4  ;;  %s3656_s17 = int_to_ptr.hbm [resolvable:$true] %s3655_s17 }
 0x982   : > { %s3657_s25 = scalar_lea.hbm %s3656_s17, 16  ;;  %p3662_p11 = scmp.lt.s32.totalorder %s3656_s17, %s4966_s11 }
 0x983   : > { %p3658_p13 = scmp.ne.s32.totalorder %s3656_s17, %s3657_s25  ;;  %p3663_p2 = scmp.lt.s32.totalorder %s3661_s9, %s3657_s25 }
 0x985   : > { %p3659_p5 = pnand %p3658_p13, %p3992_p7  ;;  %p3664_p4 = por %p3663_p2, %p3662_p11 }
 0x987   : > { %p3660_p1 = pneg %p3659_p5 }
 0x989   : > { %p3665_p10 = pnand %p3664_p4, %p3660_p1 }
 0x98b   : > { %3668 = shalt.err (!%p3665_p10)
}
 0x98c   : > { %s3767_s16 = smov 128   ;;  %s4967_s1 = sld [smem:[#allocation49_spill]] }
 0x98d   : > { %3282 = dma.vmem_to_hbm [thread:$0]  (%p3992_p7), %s2839_s22, 256, %s2841_s0, %s2826_s3, %s3767_s16, %s3767_s16, %s3766_s4  }
 0x98e   : > { %s3768_s7 = smov [#allocation15]   ;;  %p4968_p0 = scmp.eq.s32.totalorder %s3973_s14, 1 }
 0x98f   : > { %s2852_s10 = sshll.u32 %s3768_s7, 4  ;;  %s2853_s10 = int_to_ptr.vmem [resolvable:$true] %s2852_s10 }
 0x990   : > { %p4969_p12 = pmov %p4968_p0 }
 0x992   : > { %s2854_s27 = sshll.u32 %s4967_s1, 4  ;;  %s2855_s27 = int_to_ptr.hbm [resolvable:$true] %s2854_s27 }
 0x993   : > { %3284 = dma.vmem_to_hbm [thread:$0]  (%p4968_p0), %s2853_s10, 256, %s2855_s27, [#allocation16], %s3767_s16, %s3767_s16, %s3766_s4  }
 0x994   : > { %3730 = dma.done.wait (%p4969_p12), [#allocation16], 256   ;;  %p4970_p3 = pmov %p4968_p0 }
 0x996   : > { %3732 = vsyncadd (%p4970_p3), [#allocation16], 4294967040 }
 0x997 PF: > { %s4971_s12 = sld [smem:[#allocation23_spill]]  ;;  %p4973_p7 = scmp.ge.s32.totalorder %s3751_s24, 2 }
 0x999   : > { %p3309_p6 = pnand %p4973_p7, %p3996_p9 }
 0x99b   : > { %p3310_p8 = pneg %p3309_p6 }
 0x99d   : > { %s2874_s23 = sand.u32 1, %s4971_s12  }
 0x99e   : > { %s2875_s8 = scalar_lea.sflag [#allocation5], %s2874_s23 }
 0x99f   : > { %3734 = dma.done.wait (%p3310_p8), %s2875_s8, 256  }
 0x9a0   : > { %3736 = vsyncadd (%p3310_p8), %s2875_s8, 4294967040  ;;  %s4974_s24 = sld [smem:[#allocation26_spill]] }
 0x9a1   : > { %s4975_s1 = sld [smem:[#allocation24_spill]] }
 0x9a2   : > { %s4976_s22 = sld [smem:[#allocation25_spill]] }
 0x9a3   : > { %s4977_s23 = sld [smem:[#allocation27_spill]] }
 0x9a6   : > { %p42_p13 = scmp.ge.s32.totalorder %s4974_s24, 4  }
 0x9a8   :  { %44 = sbr.rel (!%p42_p13) target bundleno = 32 (0x20), region = 243 }
 0x9ad   :  { %2881 = vsyncpa [#allocation4], 1 }
 0x9ae   :  { %2883 = vsyncpa [#allocation4 + $0x1], 1 }
 0x9af   :  { %2884 = vsyncpa [#allocation7], 1 }
 0x9b0   :  { %2886 = vsyncpa [#allocation7 + $0x1], 1 }
 0x9b1   :  { %2887 = vsyncpa [#allocation10], 1 }
 0x9b2   :  { %2889 = vsyncpa [#allocation10 + $0x1], 1 }
 0x9b3   :  { %2890 = vsyncpa [#allocation13], 1 }
 0x9b4   :  { %2892 = vsyncpa [#allocation13 + $0x1], 1 }
 0x9b5   :  { %2893 = vsyncpa [#allocation5], 1 }
 0x9b6   :  { %2895 = vsyncpa [#allocation5 + $0x1], 1 }
 0x9b7   :  { %2896 = vsyncpa [#allocation16], 1 }

</bundles_post_ra>
